<compile_context>
chip_gen: v5e
topology: v5e:2x2
jax: 0.10.0
libtpu: 0.0.40
codegen_flags: <defaults>
</compile_context>

<pallas_src>
import functools

import jax
import jax.numpy as jnp
from jax.experimental import pallas as pl
from jax.experimental.pallas import tpu as pltpu

EPS_IN = 1e-5  # torch.nn.InstanceNorm2d default eps
EPS = 1e-8     # epsilons used explicitly in Grouper8.forward


def _grouper8_kernel(
    gin_ref,      # (1, P, Cn+3)  [grouped neighbor feats | grouped relative xyz]
    d2_ref,       # (1, M, ns)    squared neighbor distances (f32)
    qfeat_ref,    # (1, M, Cq)    per-query features
    idn_ref,      # (1, M, ns)    validity indicator (1 = in-radius neighbor)
    qw_ref, qb_ref,        # query_feats_mlps                   (Cq, 32), (1, 32)
    w1_ref, b1_ref,        # block-diag [neigh | ad_xyz l1 | xyz]  (Cn+3, 96), (1, 96)
    w2_ref,                # block-diag [mlps | adf head | adx head]  (96, mlp_out+2)
    mlpb_ref,              # (1, mlp_out)
    adfw_ref, adfb_ref,    # (1, 32), (1, 1)   ad_feats head (query side) + bias
    adxb2_ref,             # (1, 1)            ad_xyz layer-2 bias
    out_ref,               # (1, M, c_pad) = [xyz_feat(32) | point_feat | 0-pad]
    *, M, ns, mlp_out):
  """One batch element per grid step."""
  f32 = jnp.float32

  def inorm_rows(y):
    # InstanceNorm2d(affine=False): per-channel stats over the rows of y
    # (the sample's spatial extent).  Single pass: E[x^2] - E[x]^2.
    inv_n = 1.0 / y.shape[0]
    m = jnp.sum(y, axis=0, keepdims=True) * inv_n
    ms = jnp.sum(y * y, axis=0, keepdims=True) * inv_n
    var = jnp.maximum(ms - m * m, 0.0)
    return (y - m) * jax.lax.rsqrt(var + EPS_IN)

  def inorm_all(y):
    # single-channel instance norm: stats over the full (M, ns) spatial extent.
    inv_n = 1.0 / (y.shape[0] * y.shape[1])
    s = jnp.sum(jnp.sum(y, axis=-1, keepdims=True), axis=0, keepdims=True)
    ss = jnp.sum(jnp.sum(y * y, axis=-1, keepdims=True), axis=0, keepdims=True)
    m = s * inv_n
    var = jnp.maximum(ss * inv_n - m * m, 0.0)
    return (y - m) * jax.lax.rsqrt(var + EPS_IN)

  def adaptive_softmax(vals, inv_idn):
    # exp(vals)/(idn+eps) / (sum_ns(...) + eps).  Per-row max subtraction is
    # mathematically equivalent up to the tiny +eps term and guards exp overflow.
    vmax = jnp.max(vals, axis=-1, keepdims=True)
    ev = jnp.exp(vals - vmax) * inv_idn                       # (M, ns)
    denom = jnp.sum(ev, axis=-1, keepdims=True) + EPS
    return ev * pl.reciprocal(denom, approx=True)

  gin = gin_ref[0]           # (P, Cn+3)
  d2 = d2_ref[0]             # (M, ns)
  qfeat = qfeat_ref[0]       # (M, Cq)
  idn = idn_ref[0]           # (M, ns)

  # --- query_feats_mlps: Cq -> 32, ReLU, IN (spatial extent M) ---
  q32 = jnp.dot(qfeat, qw_ref[...], preferred_element_type=f32) + qb_ref[...]
  q32 = inorm_rows(jnp.maximum(q32, 0.0))                                 # (M, 32)

  # --- merged block-diagonal matmul #1 over the shared P rows ---
  #   cols  0:32  neighbor_feats_mlps (ReLU)
  #   cols 32:64  ad_xyz_mlps layer 1 (activation=None)
  #   cols 64:96  xyz_mlps            (ReLU)
  y96 = jnp.dot(gin, w1_ref[...], preferred_element_type=f32) + b1_ref[...]
  col = jax.lax.broadcasted_iota(jnp.int32, (1, 96), 1)
  relu_cols = jnp.logical_or(col < 32, col >= 64)
  y96 = jnp.where(relu_cols, jnp.maximum(y96, 0.0), y96)
  a96 = inorm_rows(y96)        # one single-pass IN over the lane-dense (P, 96)

  # --- merged block-diagonal matmul #2: mlps + the two 32->1 heads (f32) ---
  #   cols 0:mlp_out : mlps          (input = a96[:, :32])
  #   col  mlp_out   : ad_feats head (adf_w . a96[:, :32])
  #   col  mlp_out+1 : ad_xyz l2     (adx_w2 . a96[:, 32:64])
  out2 = jnp.dot(a96, w2_ref[...], preferred_element_type=f32)     # (P, mlp_out+2)
  nf_out = inorm_rows(jnp.maximum(out2[:, :mlp_out] + mlpb_ref[...], 0.0))

  heads = out2.reshape(M, ns, mlp_out + 2)[:, :, mlp_out:]         # (M, ns, 2)
  sel = jax.lax.broadcasted_iota(jnp.int32, (M, ns, 2), 2)
  fd_n = jnp.sum(jnp.where(sel == 0, heads, 0.0), axis=-1)         # (M, ns)
  sd_n = jnp.sum(jnp.where(sel == 1, heads, 0.0), axis=-1)         # (M, ns)

  # --- validity handling, (M, ns) lane layout ---
  # TODO(synk): `idn` of the custom CUDA QueryAndGroup is interpreted as a
  # per-slot validity indicator (1 = genuine in-radius neighbor).  The reference
  # really does divide exp(.) by (idn + 1e-8), amplifying padded slots of
  # partially-filled groups — kept exactly as the spec does it.
  idn_mask = (jnp.sum(idn, axis=-1, keepdims=True) > 0.0).astype(f32)     # (M, 1)
  _idn = jnp.where(idn_mask > 0.0, idn, 1.0)                              # (M, ns)
  inv_idn = pl.reciprocal(_idn + EPS, approx=True)

  # --- ad_feats_mlps: conv(q - n) = w.q - w.n + b; IN over (M, ns); softmax ---
  fd_q = jnp.sum(q32 * adfw_ref[...], axis=-1, keepdims=True)             # (M, 1)
  fd = inorm_all(fd_q - fd_n + adfb_ref[...])
  fd_w = adaptive_softmax(fd, inv_idn)

  # --- ad_xyz_mlps layer 2 + softmax ---
  sd = inorm_all(sd_n + adxb2_ref[...])
  sd_w = adaptive_softmax(sd, inv_idn)

  bi_w = fd_w * sd_w                                                      # (M, ns)

  # --- inverse-distance weights (d2 arrives f32 from the wrapper) ---
  dist_recip = pl.reciprocal(jnp.sqrt(d2) + EPS, approx=True) * inv_idn
  w = dist_recip * pl.reciprocal(
      jnp.sum(dist_recip, axis=-1, keepdims=True) + EPS, approx=True)
  bi_w = w * bi_w
  normed_bi = bi_w * pl.reciprocal(
      jnp.sum(bi_w, axis=-1, keepdims=True) + EPS, approx=True)
  normed_bi = normed_bi * idn_mask                                        # (M, ns)

  # --- weighted sum over nsample of the mlps output ---
  feat_out = jnp.sum(normed_bi[:, :, None] * nf_out.reshape(M, ns, mlp_out),
                     axis=1)                                              # (M, mlp_out)

  # --- xyz branch: max-pool over nsample ---
  xyz_out = jnp.max(a96[:, 64:].reshape(M, ns, 32), axis=1)               # (M, 32)

  # --- lane-dense slice stores into the lane-padded output block ---
  # TODO(synk): for production M (>= 128) emit the block pre-transposed (C, M)
  # via an in-kernel XLU transpose so the wrapper's (B,M,C)->(B,C,M) transpose
  # (an extra HBM round trip of the output) disappears; at the tiny demo M that
  # store would be lane-sparse, so the lane-dense (M, C) layout is kept here.
  out_ref[0, :, :32] = xyz_out
  out_ref[0, :, 32:32 + mlp_out] = feat_out
  c_pad = out_ref.shape[-1]
  if 32 + mlp_out < c_pad:   # static
    out_ref[0, :, 32 + mlp_out:] = jnp.zeros((M, c_pad - 32 - mlp_out), f32)


def init_params(key, query_ch, neigh_ch, mlp_spec):
  """Deterministic, kaiming-like conv weights; zero biases (as pt_utils does).

  Conv weights are stored already transposed as (Cin, Cout); biases as (1, Cout).
  """
  ks = jax.random.split(key, 7)

  def kaiming(k, cin, cout):
    return jax.random.normal(k, (cin, cout), jnp.float32) * jnp.sqrt(2.0 / cin)

  return {
      "q_w": kaiming(ks[0], query_ch, 32), "q_b": jnp.zeros((1, 32), jnp.float32),
      "n_w": kaiming(ks[1], neigh_ch, 32), "n_b": jnp.zeros((1, 32), jnp.float32),
      "adf_w": kaiming(ks[2], 32, 1), "adf_b": jnp.zeros((1, 1), jnp.float32),
      "adx_w1": kaiming(ks[3], 3, 32), "adx_b1": jnp.zeros((1, 32), jnp.float32),
      "adx_w2": kaiming(ks[4], 32, 1), "adx_b2": jnp.zeros((1, 1), jnp.float32),
      "mlp_w": kaiming(ks[5], mlp_spec[0], mlp_spec[1]),
      "mlp_b": jnp.zeros((1, mlp_spec[1]), jnp.float32),
      "xyz_w": kaiming(ks[6], 3, 32), "xyz_b": jnp.zeros((1, 32), jnp.float32),
  }


def grouper8_forward(params, xyz, new_xyz, features, query_features, *,
                     radius, nsample, matmul_dtype=jnp.bfloat16):
  """xyz (B,N,3), new_xyz (B,M,3), features (B,Cn,N), query_features (B,Cq,M).

  matmul_dtype controls the dtype of the dominant grouped-input / query-feature
  DMAs and of MXU pass #1 (bf16 default halves the dominant HBM bytes; all
  accumulation, instance-norm, softmax and distance math stays f32).  Use
  jnp.float32 for near-reference numerics.
  """
  f32 = jnp.float32
  B, N, _ = xyz.shape
  M = new_xyz.shape[1]
  Cn = features.shape[1]
  Cq = query_features.shape[1]
  ns = nsample                        # keep a multiple of 8 so (P,C)->(M,ns,C)
  P = M * ns                          # reshapes remain free sublane splits
  Cin = Cn + 3
  mlp_out = params["mlp_w"].shape[1]
  c_real = 32 + mlp_out
  c_pad = ((c_real + 127) // 128) * 128     # lane-dense output store

  # ---- glue: ball query + grouping (QueryAndGroup). Standard pointnet2 ball
  # query semantics: first `nsample` in-radius indices (index order); empty
  # slots padded with the first found index; all-zero if no neighbor.
  # TODO(synk): pull this gather into the kernel (idx via PrefetchScalarGridSpec
  # in SMEM + per-row DMA gather, or a per-batch (N, Cn) VMEM slab + jnp.take)
  # so the nsample-times-inflated grouped tensor never round-trips HBM, and
  # replace the O(B*M*N log N) argsort with a dedicated ball-query kernel.
  d2_all = jnp.sum(jnp.square(new_xyz[:, :, None, :] - xyz[:, None, :, :]), axis=-1)
  within = d2_all < radius * radius
  ar = jnp.arange(N)[None, None, :]
  order = jnp.argsort(jnp.where(within, ar, N + ar), axis=-1)[..., :ns]   # (B,M,ns)
  cnt = jnp.sum(within.astype(jnp.int32), axis=-1)                        # (B,M)
  valid = jnp.arange(ns)[None, None, :] < cnt[..., None]                  # (B,M,ns)
  idx = jnp.where(valid, order, order[..., :1])
  idn = valid.astype(f32)                                                 # (B,M,ns)

  b_idx = jnp.arange(B)[:, None, None]
  grouped_xyz = xyz[b_idx, idx] - new_xyz[:, :, None, :]                  # (B,M,ns,3)
  grouped_feats = jnp.transpose(features, (0, 2, 1))[b_idx, idx]          # (B,M,ns,Cn)

  # Merged [feats | xyz] input: one lane-dense DMA feeding MXU pass #1.
  gin = jnp.concatenate([grouped_feats, grouped_xyz], axis=-1)
  gin = gin.reshape(B, P, Cin).astype(matmul_dtype)
  # Squared distances for the inverse-distance weights stay f32; this is 3x
  # fewer bytes than shipping the lane-sparse (P, 3) grouped xyz separately.
  d2 = jnp.sum(jnp.square(grouped_xyz), axis=-1).astype(f32)              # (B,M,ns)
  qfeat = jnp.transpose(query_features, (0, 2, 1)).astype(matmul_dtype)   # (B,M,Cq)

  # ---- block-diagonal fused weights ----
  w1 = jnp.zeros((Cin, 96), f32)
  w1 = w1.at[:Cn, :32].set(params["n_w"])          # neighbor_feats_mlps
  w1 = w1.at[Cn:, 32:64].set(params["adx_w1"])     # ad_xyz_mlps layer 1
  w1 = w1.at[Cn:, 64:96].set(params["xyz_w"])      # xyz_mlps
  b1 = jnp.concatenate([params["n_b"], params["adx_b1"], params["xyz_b"]], axis=1)

  w2 = jnp.zeros((96, mlp_out + 2), f32)
  w2 = w2.at[:32, :mlp_out].set(params["mlp_w"])               # mlps
  w2 = w2.at[:32, mlp_out].set(params["adf_w"][:, 0])          # ad_feats head (neighbor)
  w2 = w2.at[32:64, mlp_out + 1].set(params["adx_w2"][:, 0])   # ad_xyz layer 2

  weights = [
      params["q_w"].astype(matmul_dtype), params["q_b"].astype(f32),
      w1.astype(matmul_dtype), b1.astype(f32),
      w2.astype(f32), params["mlp_b"].astype(f32),
      params["adf_w"].astype(f32).T, params["adf_b"].astype(f32),
      params["adx_b2"].astype(f32),
  ]

  def bspec(shape, pipeline_mode=None):     # per-batch block (leading dim = 1)
    rest = tuple(shape[1:])
    idx_map = lambda b, _n=len(rest): (b,) + (0,) * _n
    if pipeline_mode is None:
      return pl.BlockSpec((1,) + rest, idx_map)
    return pl.BlockSpec((1,) + rest, idx_map, pipeline_mode=pipeline_mode)

  def wspec(shape):                          # full (replicated) weight block
    nd = len(shape)
    return pl.BlockSpec(tuple(shape), lambda b, _n=nd: (0,) * _n)

  itemsize = jnp.dtype(matmul_dtype).itemsize
  gin_block_bytes = P * Cin * itemsize
  # Deeper pipelining on the dominant input (128 MiB-VMEM parts afford it); only
  # when there are enough grid steps for it to matter and the third buffer
  # clearly fits the conservative, v7x-safe budget below.
  gin_mode = pl.Buffered(3) if (B >= 3 and 3 * gin_block_bytes < 24 * 2**20) else None

  in_specs = [bspec(gin.shape, gin_mode), bspec(d2.shape), bspec(qfeat.shape),
              bspec(idn.shape)]
  in_specs += [wspec(w.shape) for w in weights]

  # Advisory cost estimate so XLA can overlap the ball-query glue with the call.
  flops = 2 * B * (M * Cq * 32 + P * Cin * 96 + P * 96 * (mlp_out + 2))
  weight_bytes = sum(int(w.size) * jnp.dtype(w.dtype).itemsize for w in weights)
  cost = pl.CostEstimate(
      flops=int(flops),
      transcendentals=int(8 * B * M * ns),
      bytes_accessed=int(B * (P * Cin + M * Cq) * itemsize
                         + B * M * (2 * ns + c_pad) * 4 + weight_bytes))

  # Scoped-VMEM request: pipelined input/output blocks (real itemsize) + weights
  # + worst-case intermediates, 2x safety factor, capped at 48 MiB so v7x
  # (64 MiB physical VMEM) keeps headroom for Mosaic internal scratch.
  nbuf = 3 if gin_mode is not None else 2
  block_bytes = (nbuf * gin_block_bytes
                 + 2 * (M * Cq * itemsize + 2 * M * ns * 4 + M * c_pad * 4))
  inter_bytes = 4 * (P * (3 * 96 + 2 * (mlp_out + 2)) + 24 * M * ns)
  vmem_limit = int(min(48 * 2**20,
                       max(16 * 2**20,
                           2 * (block_bytes + weight_bytes + inter_bytes))))

  kernel = functools.partial(_grouper8_kernel, M=M, ns=ns, mlp_out=mlp_out)

  # TODO(synk): for v7x small-batch inference (B == 1) add a parallel M-tile grid
  # axis (two-pass / scratch-carried instance-norm statistics) so both
  # TensorCores are busy; one whole sample per grid step is fine at these sizes.
  out = pl.pallas_call(
      kernel,
      out_shape=jax.ShapeDtypeStruct((B, M, c_pad), jnp.float32),
      grid=(B,),
      in_specs=in_specs,
      out_specs=pl.BlockSpec((1, M, c_pad), lambda b: (b, 0, 0)),
      compiler_params=pltpu.CompilerParams(
          dimension_semantics=("parallel",),
          vmem_limit_bytes=vmem_limit),
      cost_estimate=cost,
  )(gin, d2, qfeat, idn, *weights)

  new_features = jnp.transpose(out[:, :, :c_real], (0, 2, 1))   # (B, 32+mlp_out, M)
  return new_xyz, new_features


if __name__ == "__main__":
  root = jax.random.PRNGKey(0)
  k_xyz, k_feat, k_qfeat, k_param = jax.random.split(root, 4)

  B, N, M = 2, 32, 8
  neigh_ch, query_ch = 16, 16
  nsample = 8            # multiple of 8 keeps the (P,C)->(M,ns,C) reshapes free
  radius = 0.35
  mlp_spec = [32, 64]    # mlps[0]; input must be 32 (after neighbor_feats_mlps)

  xyz = jax.random.uniform(k_xyz, (B, N, 3), jnp.float32)
  new_xyz = xyz[:, :M, :]                                            # (B, M, 3)
  features = jax.random.normal(k_feat, (B, neigh_ch, N), jnp.float32)
  query_features = jax.random.normal(k_qfeat, (B, query_ch, M), jnp.float32)

  params = init_params(k_param, query_ch, neigh_ch, mlp_spec)

  out_xyz, out_feats = grouper8_forward(
      params, xyz, new_xyz, features, query_features,
      radius=radius, nsample=nsample)
  jax.block_until_ready(out_feats)

  assert out_xyz.shape == (B, M, 3)
  assert out_feats.shape == (B, 32 + mlp_spec[-1], M)
  assert bool(jnp.all(jnp.isfinite(out_feats)))
  print("KERNEL_OK")
</pallas_src>

<mosaic_0001>
module attributes {stable_mosaic.version = 11 : i64} {
  func.func @_grouper8_kernel(%arg0: i32, %arg1: memref<1x64x19xbf16, #tpu.memory_space<vmem>>, %arg2: memref<1x8x8xf32, #tpu.memory_space<vmem>>, %arg3: memref<1x8x16xbf16, #tpu.memory_space<vmem>>, %arg4: memref<1x8x8xf32, #tpu.memory_space<vmem>>, %arg5: memref<16x32xbf16, #tpu.memory_space<vmem>>, %arg6: memref<1x32xf32, #tpu.memory_space<vmem>>, %arg7: memref<19x96xbf16, #tpu.memory_space<vmem>>, %arg8: memref<1x96xf32, #tpu.memory_space<vmem>>, %arg9: memref<96x66xf32, #tpu.memory_space<vmem>>, %arg10: memref<1x64xf32, #tpu.memory_space<vmem>>, %arg11: memref<1x32xf32, #tpu.memory_space<vmem>>, %arg12: memref<1x1xf32, #tpu.memory_space<vmem>>, %arg13: memref<1x1xf32, #tpu.memory_space<vmem>>, %arg14: memref<1x8x128xf32, #tpu.memory_space<vmem>>) attributes {dimension_semantics = [#tpu.dimension_semantics<parallel>], iteration_bounds = array<i64: 2>, scalar_prefetch = 0 : i64, scratch_operands = 0 : i64, tpu.core_type = #tpu.core_type<tc>, window_params = [{transform_indices = @transform_0, window_bounds = array<i64: 1, 64, 19>}, {transform_indices = @transform_1, window_bounds = array<i64: 1, 8, 8>}, {transform_indices = @transform_2, window_bounds = array<i64: 1, 8, 16>}, {transform_indices = @transform_3, window_bounds = array<i64: 1, 8, 8>}, {pipeline_mode = #tpu.pipeline_mode<synchronous>, transform_indices = @transform_4, window_bounds = array<i64: 16, 32>}, {pipeline_mode = #tpu.pipeline_mode<synchronous>, transform_indices = @transform_5, window_bounds = array<i64: 1, 32>}, {pipeline_mode = #tpu.pipeline_mode<synchronous>, transform_indices = @transform_6, window_bounds = array<i64: 19, 96>}, {pipeline_mode = #tpu.pipeline_mode<synchronous>, transform_indices = @transform_7, window_bounds = array<i64: 1, 96>}, {pipeline_mode = #tpu.pipeline_mode<synchronous>, transform_indices = @transform_8, window_bounds = array<i64: 96, 66>}, {pipeline_mode = #tpu.pipeline_mode<synchronous>, transform_indices = @transform_9, window_bounds = array<i64: 1, 64>}, {pipeline_mode = #tpu.pipeline_mode<synchronous>, transform_indices = @transform_10, window_bounds = array<i64: 1, 32>}, {pipeline_mode = #tpu.pipeline_mode<synchronous>, transform_indices = @transform_11, window_bounds = array<i64: 1, 1>}, {pipeline_mode = #tpu.pipeline_mode<synchronous>, transform_indices = @transform_12, window_bounds = array<i64: 1, 1>}, {transform_indices = @transform_13, window_bounds = array<i64: 1, 8, 128>}]} {
    %c0 = arith.constant 0 : index
    %c0_0 = arith.constant 0 : index
    %c0_1 = arith.constant 0 : index
    %0 = vector.load %arg1[%c0, %c0_0, %c0_1] : memref<1x64x19xbf16, #tpu.memory_space<vmem>>, vector<1x64x19xbf16>
    %1 = vector.shape_cast %0 : vector<1x64x19xbf16> to vector<64x19xbf16>
    %c0_2 = arith.constant 0 : index
    %c0_3 = arith.constant 0 : index
    %c0_4 = arith.constant 0 : index
    %2 = vector.load %arg2[%c0_2, %c0_3, %c0_4] : memref<1x8x8xf32, #tpu.memory_space<vmem>>, vector<1x8x8xf32>
    %3 = vector.shape_cast %2 : vector<1x8x8xf32> to vector<8x8xf32>
    %c0_5 = arith.constant 0 : index
    %c0_6 = arith.constant 0 : index
    %c0_7 = arith.constant 0 : index
    %4 = vector.load %arg3[%c0_5, %c0_6, %c0_7] : memref<1x8x16xbf16, #tpu.memory_space<vmem>>, vector<1x8x16xbf16>
    %5 = vector.shape_cast %4 : vector<1x8x16xbf16> to vector<8x16xbf16>
    %c0_8 = arith.constant 0 : index
    %c0_9 = arith.constant 0 : index
    %c0_10 = arith.constant 0 : index
    %6 = vector.load %arg4[%c0_8, %c0_9, %c0_10] : memref<1x8x8xf32, #tpu.memory_space<vmem>>, vector<1x8x8xf32>
    %7 = vector.shape_cast %6 : vector<1x8x8xf32> to vector<8x8xf32>
    %c0_11 = arith.constant 0 : index
    %c0_12 = arith.constant 0 : index
    %8 = vector.load %arg5[%c0_11, %c0_12] : memref<16x32xbf16, #tpu.memory_space<vmem>>, vector<16x32xbf16>
    %cst = arith.constant dense<0.000000e+00> : vector<8x32xf32>
    %9 = tpu.matmul %5, %8, %cst {dimension_numbers = #tpu.dot_dimension_numbers<[1], [0], [0], [1], [0, 0, 1, 1], [], []>} : vector<8x16xbf16>, vector<16x32xbf16>, vector<8x32xf32> -> vector<8x32xf32>
    %c0_13 = arith.constant 0 : index
    %c0_14 = arith.constant 0 : index
    %10 = vector.load %arg6[%c0_13, %c0_14] : memref<1x32xf32, #tpu.memory_space<vmem>>, vector<1x32xf32>
    %11 = vector.broadcast %10 : vector<1x32xf32> to vector<8x32xf32>
    %12 = arith.addf %9, %11 : vector<8x32xf32>
    %cst_15 = arith.constant 0.000000e+00 : f32
    %13 = vector.broadcast %cst_15 : f32 to vector<8x32xf32>
    %14 = arith.maximumf %12, %13 : vector<8x32xf32>
    %cst_16 = arith.constant dense<0.000000e+00> : vector<32xf32>
    %15 = vector.multi_reduction <add>, %14, %cst_16 [0] : vector<8x32xf32> to vector<32xf32>
    %16 = vector.shape_cast %15 : vector<32xf32> to vector<1x32xf32>
    %cst_17 = arith.constant 1.250000e-01 : f32
    %17 = vector.broadcast %cst_17 : f32 to vector<1x32xf32>
    %18 = arith.mulf %16, %17 : vector<1x32xf32>
    %19 = arith.mulf %14, %14 : vector<8x32xf32>
    %cst_18 = arith.constant dense<0.000000e+00> : vector<32xf32>
    %20 = vector.multi_reduction <add>, %19, %cst_18 [0] : vector<8x32xf32> to vector<32xf32>
    %21 = vector.shape_cast %20 : vector<32xf32> to vector<1x32xf32>
    %cst_19 = arith.constant 1.250000e-01 : f32
    %22 = vector.broadcast %cst_19 : f32 to vector<1x32xf32>
    %23 = arith.mulf %21, %22 : vector<1x32xf32>
    %24 = arith.mulf %18, %18 : vector<1x32xf32>
    %25 = arith.subf %23, %24 : vector<1x32xf32>
    %cst_20 = arith.constant 0.000000e+00 : f32
    %26 = vector.broadcast %cst_20 : f32 to vector<1x32xf32>
    %27 = arith.maximumf %25, %26 : vector<1x32xf32>
    %28 = vector.broadcast %18 : vector<1x32xf32> to vector<8x32xf32>
    %29 = arith.subf %14, %28 : vector<8x32xf32>
    %cst_21 = arith.constant 9.99999974E-6 : f32
    %30 = vector.broadcast %cst_21 : f32 to vector<1x32xf32>
    %31 = arith.addf %27, %30 : vector<1x32xf32>
    %32 = math.rsqrt %31 : vector<1x32xf32>
    %33 = vector.broadcast %32 : vector<1x32xf32> to vector<8x32xf32>
    %34 = arith.mulf %29, %33 : vector<8x32xf32>
    %c0_22 = arith.constant 0 : index
    %c0_23 = arith.constant 0 : index
    %35 = vector.load %arg7[%c0_22, %c0_23] : memref<19x96xbf16, #tpu.memory_space<vmem>>, vector<19x96xbf16>
    %cst_24 = arith.constant dense<0.000000e+00> : vector<64x96xf32>
    %36 = tpu.matmul %1, %35, %cst_24 {dimension_numbers = #tpu.dot_dimension_numbers<[1], [0], [0], [1], [0, 0, 1, 1], [], []>} : vector<64x19xbf16>, vector<19x96xbf16>, vector<64x96xf32> -> vector<64x96xf32>
    %c0_25 = arith.constant 0 : index
    %c0_26 = arith.constant 0 : index
    %37 = vector.load %arg8[%c0_25, %c0_26] : memref<1x96xf32, #tpu.memory_space<vmem>>, vector<1x96xf32>
    %38 = vector.broadcast %37 : vector<1x96xf32> to vector<64x96xf32>
    %39 = arith.addf %36, %38 : vector<64x96xf32>
    %40 = tpu.iota {dimensions = array<i32: 1>} : vector<1x96xi32>
    %c32_i32 = arith.constant 32 : i32
    %41 = vector.broadcast %c32_i32 : i32 to vector<1x96xi32>
    %42 = arith.cmpi slt, %40, %41 : vector<1x96xi32>
    %c64_i32 = arith.constant 64 : i32
    %43 = vector.broadcast %c64_i32 : i32 to vector<1x96xi32>
    %44 = arith.cmpi sge, %40, %43 : vector<1x96xi32>
    %45 = arith.ori %42, %44 : vector<1x96xi1>
    %cst_27 = arith.constant 0.000000e+00 : f32
    %46 = vector.broadcast %cst_27 : f32 to vector<64x96xf32>
    %47 = arith.maximumf %39, %46 : vector<64x96xf32>
    %48 = vector.shape_cast %45 : vector<1x96xi1> to vector<1x96xi1>
    %49 = vector.broadcast %48 : vector<1x96xi1> to vector<64x96xi1>
    %50 = arith.select %49, %47, %39 : vector<64x96xi1>, vector<64x96xf32>
    %cst_28 = arith.constant dense<0.000000e+00> : vector<96xf32>
    %51 = vector.multi_reduction <add>, %50, %cst_28 [0] : vector<64x96xf32> to vector<96xf32>
    %52 = vector.shape_cast %51 : vector<96xf32> to vector<1x96xf32>
    %cst_29 = arith.constant 1.562500e-02 : f32
    %53 = vector.broadcast %cst_29 : f32 to vector<1x96xf32>
    %54 = arith.mulf %52, %53 : vector<1x96xf32>
    %55 = arith.mulf %50, %50 : vector<64x96xf32>
    %cst_30 = arith.constant dense<0.000000e+00> : vector<96xf32>
    %56 = vector.multi_reduction <add>, %55, %cst_30 [0] : vector<64x96xf32> to vector<96xf32>
    %57 = vector.shape_cast %56 : vector<96xf32> to vector<1x96xf32>
    %cst_31 = arith.constant 1.562500e-02 : f32
    %58 = vector.broadcast %cst_31 : f32 to vector<1x96xf32>
    %59 = arith.mulf %57, %58 : vector<1x96xf32>
    %60 = arith.mulf %54, %54 : vector<1x96xf32>
    %61 = arith.subf %59, %60 : vector<1x96xf32>
    %cst_32 = arith.constant 0.000000e+00 : f32
    %62 = vector.broadcast %cst_32 : f32 to vector<1x96xf32>
    %63 = arith.maximumf %61, %62 : vector<1x96xf32>
    %64 = vector.broadcast %54 : vector<1x96xf32> to vector<64x96xf32>
    %65 = arith.subf %50, %64 : vector<64x96xf32>
    %cst_33 = arith.constant 9.99999974E-6 : f32
    %66 = vector.broadcast %cst_33 : f32 to vector<1x96xf32>
    %67 = arith.addf %63, %66 : vector<1x96xf32>
    %68 = math.rsqrt %67 : vector<1x96xf32>
    %69 = vector.broadcast %68 : vector<1x96xf32> to vector<64x96xf32>
    %70 = arith.mulf %65, %69 : vector<64x96xf32>
    %c0_34 = arith.constant 0 : index
    %c0_35 = arith.constant 0 : index
    %71 = vector.load %arg9[%c0_34, %c0_35] : memref<96x66xf32, #tpu.memory_space<vmem>>, vector<96x66xf32>
    %cst_36 = arith.constant dense<0.000000e+00> : vector<64x66xf32>
    %72 = tpu.matmul %70, %71, %cst_36 {dimension_numbers = #tpu.dot_dimension_numbers<[1], [0], [0], [1], [0, 0, 1, 1], [], []>} : vector<64x96xf32>, vector<96x66xf32>, vector<64x66xf32> -> vector<64x66xf32>
    %73 = vector.extract_strided_slice %72 {offsets = [0, 0], sizes = [64, 64], strides = [1, 1]} : vector<64x66xf32> to vector<64x64xf32>
    %c0_37 = arith.constant 0 : index
    %c0_38 = arith.constant 0 : index
    %74 = vector.load %arg10[%c0_37, %c0_38] : memref<1x64xf32, #tpu.memory_space<vmem>>, vector<1x64xf32>
    %75 = vector.broadcast %74 : vector<1x64xf32> to vector<64x64xf32>
    %76 = arith.addf %73, %75 : vector<64x64xf32>
    %cst_39 = arith.constant 0.000000e+00 : f32
    %77 = vector.broadcast %cst_39 : f32 to vector<64x64xf32>
    %78 = arith.maximumf %76, %77 : vector<64x64xf32>
    %cst_40 = arith.constant dense<0.000000e+00> : vector<64xf32>
    %79 = vector.multi_reduction <add>, %78, %cst_40 [0] : vector<64x64xf32> to vector<64xf32>
    %80 = vector.shape_cast %79 : vector<64xf32> to vector<1x64xf32>
    %cst_41 = arith.constant 1.562500e-02 : f32
    %81 = vector.broadcast %cst_41 : f32 to vector<1x64xf32>
    %82 = arith.mulf %80, %81 : vector<1x64xf32>
    %83 = arith.mulf %78, %78 : vector<64x64xf32>
    %cst_42 = arith.constant dense<0.000000e+00> : vector<64xf32>
    %84 = vector.multi_reduction <add>, %83, %cst_42 [0] : vector<64x64xf32> to vector<64xf32>
    %85 = vector.shape_cast %84 : vector<64xf32> to vector<1x64xf32>
    %cst_43 = arith.constant 1.562500e-02 : f32
    %86 = vector.broadcast %cst_43 : f32 to vector<1x64xf32>
    %87 = arith.mulf %85, %86 : vector<1x64xf32>
    %88 = arith.mulf %82, %82 : vector<1x64xf32>
    %89 = arith.subf %87, %88 : vector<1x64xf32>
    %cst_44 = arith.constant 0.000000e+00 : f32
    %90 = vector.broadcast %cst_44 : f32 to vector<1x64xf32>
    %91 = arith.maximumf %89, %90 : vector<1x64xf32>
    %92 = vector.broadcast %82 : vector<1x64xf32> to vector<64x64xf32>
    %93 = arith.subf %78, %92 : vector<64x64xf32>
    %cst_45 = arith.constant 9.99999974E-6 : f32
    %94 = vector.broadcast %cst_45 : f32 to vector<1x64xf32>
    %95 = arith.addf %91, %94 : vector<1x64xf32>
    %96 = math.rsqrt %95 : vector<1x64xf32>
    %97 = vector.broadcast %96 : vector<1x64xf32> to vector<64x64xf32>
    %98 = arith.mulf %93, %97 : vector<64x64xf32>
    %99 = vector.shape_cast %72 : vector<64x66xf32> to vector<8x8x66xf32>
    %100 = vector.extract_strided_slice %99 {offsets = [0, 0, 64], sizes = [8, 8, 2], strides = [1, 1, 1]} : vector<8x8x66xf32> to vector<8x8x2xf32>
    %101 = tpu.iota {dimensions = array<i32: 2>} : vector<8x8x2xi32>
    %c0_i32 = arith.constant 0 : i32
    %102 = vector.broadcast %c0_i32 : i32 to vector<8x8x2xi32>
    %103 = arith.cmpi eq, %101, %102 : vector<8x8x2xi32>
    %cst_46 = arith.constant 0.000000e+00 : f32
    %104 = vector.broadcast %cst_46 : f32 to vector<8x8x2xf32>
    %105 = arith.select %103, %100, %104 : vector<8x8x2xi1>, vector<8x8x2xf32>
    %cst_47 = arith.constant dense<0.000000e+00> : vector<8x8xf32>
    %106 = vector.multi_reduction <add>, %105, %cst_47 [2] : vector<8x8x2xf32> to vector<8x8xf32>
    %c1_i32 = arith.constant 1 : i32
    %107 = vector.broadcast %c1_i32 : i32 to vector<8x8x2xi32>
    %108 = arith.cmpi eq, %101, %107 : vector<8x8x2xi32>
    %cst_48 = arith.constant 0.000000e+00 : f32
    %109 = vector.broadcast %cst_48 : f32 to vector<8x8x2xf32>
    %110 = arith.select %108, %100, %109 : vector<8x8x2xi1>, vector<8x8x2xf32>
    %cst_49 = arith.constant dense<0.000000e+00> : vector<8x8xf32>
    %111 = vector.multi_reduction <add>, %110, %cst_49 [2] : vector<8x8x2xf32> to vector<8x8xf32>
    %cst_50 = arith.constant dense<0.000000e+00> : vector<8xf32>
    %112 = vector.multi_reduction <add>, %7, %cst_50 [1] : vector<8x8xf32> to vector<8xf32>
    %113 = vector.shape_cast %112 : vector<8xf32> to vector<8x1xf32>
    %cst_51 = arith.constant 0.000000e+00 : f32
    %114 = vector.broadcast %cst_51 : f32 to vector<8x1xf32>
    %115 = arith.cmpf ogt, %113, %114 : vector<8x1xf32>
    %116 = arith.extui %115 : vector<8x1xi1> to vector<8x1xi32>
    %117 = arith.sitofp %116 : vector<8x1xi32> to vector<8x1xf32>
    %cst_52 = arith.constant 0.000000e+00 : f32
    %118 = vector.broadcast %cst_52 : f32 to vector<8x1xf32>
    %119 = arith.cmpf ogt, %117, %118 : vector<8x1xf32>
    %cst_53 = arith.constant 1.000000e+00 : f32
    %120 = vector.shape_cast %119 : vector<8x1xi1> to vector<8x1xi1>
    %121 = vector.broadcast %120 : vector<8x1xi1> to vector<8x8xi1>
    %122 = vector.broadcast %cst_53 : f32 to vector<8x8xf32>
    %123 = arith.select %121, %7, %122 : vector<8x8xi1>, vector<8x8xf32>
    %cst_54 = arith.constant 9.99999993E-9 : f32
    %124 = vector.broadcast %cst_54 : f32 to vector<8x8xf32>
    %125 = arith.addf %123, %124 : vector<8x8xf32>
    %126 = tpu.reciprocal %125 {approx = true} : vector<8x8xf32> -> vector<8x8xf32>
    %c0_55 = arith.constant 0 : index
    %c0_56 = arith.constant 0 : index
    %127 = vector.load %arg11[%c0_55, %c0_56] : memref<1x32xf32, #tpu.memory_space<vmem>>, vector<1x32xf32>
    %128 = vector.broadcast %127 : vector<1x32xf32> to vector<8x32xf32>
    %129 = arith.mulf %34, %128 : vector<8x32xf32>
    %cst_57 = arith.constant dense<0.000000e+00> : vector<8xf32>
    %130 = vector.multi_reduction <add>, %129, %cst_57 [1] : vector<8x32xf32> to vector<8xf32>
    %131 = vector.shape_cast %130 : vector<8xf32> to vector<8x1xf32>
    %132 = vector.broadcast %131 : vector<8x1xf32> to vector<8x8xf32>
    %133 = arith.subf %132, %106 : vector<8x8xf32>
    %c0_58 = arith.constant 0 : index
    %c0_59 = arith.constant 0 : index
    %134 = vector.load %arg12[%c0_58, %c0_59] : memref<1x1xf32, #tpu.memory_space<vmem>>, vector<1x1xf32>
    %135 = vector.broadcast %134 : vector<1x1xf32> to vector<8x8xf32>
    %136 = arith.addf %133, %135 : vector<8x8xf32>
    %cst_60 = arith.constant dense<0.000000e+00> : vector<8xf32>
    %137 = vector.multi_reduction <add>, %136, %cst_60 [1] : vector<8x8xf32> to vector<8xf32>
    %138 = vector.shape_cast %137 : vector<8xf32> to vector<8x1xf32>
    %cst_61 = arith.constant dense<0.000000e+00> : vector<1xf32>
    %139 = vector.multi_reduction <add>, %138, %cst_61 [0] : vector<8x1xf32> to vector<1xf32>
    %140 = vector.shape_cast %139 : vector<1xf32> to vector<1x1xf32>
    %141 = arith.mulf %136, %136 : vector<8x8xf32>
    %cst_62 = arith.constant dense<0.000000e+00> : vector<8xf32>
    %142 = vector.multi_reduction <add>, %141, %cst_62 [1] : vector<8x8xf32> to vector<8xf32>
    %143 = vector.shape_cast %142 : vector<8xf32> to vector<8x1xf32>
    %cst_63 = arith.constant dense<0.000000e+00> : vector<1xf32>
    %144 = vector.multi_reduction <add>, %143, %cst_63 [0] : vector<8x1xf32> to vector<1xf32>
    %145 = vector.shape_cast %144 : vector<1xf32> to vector<1x1xf32>
    %cst_64 = arith.constant 1.562500e-02 : f32
    %146 = vector.broadcast %cst_64 : f32 to vector<1x1xf32>
    %147 = arith.mulf %140, %146 : vector<1x1xf32>
    %cst_65 = arith.constant 1.562500e-02 : f32
    %148 = vector.broadcast %cst_65 : f32 to vector<1x1xf32>
    %149 = arith.mulf %145, %148 : vector<1x1xf32>
    %150 = arith.mulf %147, %147 : vector<1x1xf32>
    %151 = arith.subf %149, %150 : vector<1x1xf32>
    %cst_66 = arith.constant 0.000000e+00 : f32
    %152 = vector.broadcast %cst_66 : f32 to vector<1x1xf32>
    %153 = arith.maximumf %151, %152 : vector<1x1xf32>
    %154 = vector.broadcast %147 : vector<1x1xf32> to vector<8x8xf32>
    %155 = arith.subf %136, %154 : vector<8x8xf32>
    %cst_67 = arith.constant 9.99999974E-6 : f32
    %156 = vector.broadcast %cst_67 : f32 to vector<1x1xf32>
    %157 = arith.addf %153, %156 : vector<1x1xf32>
    %158 = math.rsqrt %157 : vector<1x1xf32>
    %159 = vector.broadcast %158 : vector<1x1xf32> to vector<8x8xf32>
    %160 = arith.mulf %155, %159 : vector<8x8xf32>
    %cst_68 = arith.constant dense<0xFF800000> : vector<8xf32>
    %161 = vector.multi_reduction <maximumf>, %160, %cst_68 [1] : vector<8x8xf32> to vector<8xf32>
    %162 = vector.shape_cast %161 : vector<8xf32> to vector<8x1xf32>
    %163 = vector.broadcast %162 : vector<8x1xf32> to vector<8x8xf32>
    %164 = arith.subf %160, %163 : vector<8x8xf32>
    %165 = math.exp %164 : vector<8x8xf32>
    %166 = arith.mulf %165, %126 : vector<8x8xf32>
    %cst_69 = arith.constant dense<0.000000e+00> : vector<8xf32>
    %167 = vector.multi_reduction <add>, %166, %cst_69 [1] : vector<8x8xf32> to vector<8xf32>
    %168 = vector.shape_cast %167 : vector<8xf32> to vector<8x1xf32>
    %cst_70 = arith.constant 9.99999993E-9 : f32
    %169 = vector.broadcast %cst_70 : f32 to vector<8x1xf32>
    %170 = arith.addf %168, %169 : vector<8x1xf32>
    %171 = tpu.reciprocal %170 {approx = true} : vector<8x1xf32> -> vector<8x1xf32>
    %172 = vector.broadcast %171 : vector<8x1xf32> to vector<8x8xf32>
    %173 = arith.mulf %166, %172 : vector<8x8xf32>
    %c0_71 = arith.constant 0 : index
    %c0_72 = arith.constant 0 : index
    %174 = vector.load %arg13[%c0_71, %c0_72] : memref<1x1xf32, #tpu.memory_space<vmem>>, vector<1x1xf32>
    %175 = vector.broadcast %174 : vector<1x1xf32> to vector<8x8xf32>
    %176 = arith.addf %111, %175 : vector<8x8xf32>
    %cst_73 = arith.constant dense<0.000000e+00> : vector<8xf32>
    %177 = vector.multi_reduction <add>, %176, %cst_73 [1] : vector<8x8xf32> to vector<8xf32>
    %178 = vector.shape_cast %177 : vector<8xf32> to vector<8x1xf32>
    %cst_74 = arith.constant dense<0.000000e+00> : vector<1xf32>
    %179 = vector.multi_reduction <add>, %178, %cst_74 [0] : vector<8x1xf32> to vector<1xf32>
    %180 = vector.shape_cast %179 : vector<1xf32> to vector<1x1xf32>
    %181 = arith.mulf %176, %176 : vector<8x8xf32>
    %cst_75 = arith.constant dense<0.000000e+00> : vector<8xf32>
    %182 = vector.multi_reduction <add>, %181, %cst_75 [1] : vector<8x8xf32> to vector<8xf32>
    %183 = vector.shape_cast %182 : vector<8xf32> to vector<8x1xf32>
    %cst_76 = arith.constant dense<0.000000e+00> : vector<1xf32>
    %184 = vector.multi_reduction <add>, %183, %cst_76 [0] : vector<8x1xf32> to vector<1xf32>
    %185 = vector.shape_cast %184 : vector<1xf32> to vector<1x1xf32>
    %cst_77 = arith.constant 1.562500e-02 : f32
    %186 = vector.broadcast %cst_77 : f32 to vector<1x1xf32>
    %187 = arith.mulf %180, %186 : vector<1x1xf32>
    %cst_78 = arith.constant 1.562500e-02 : f32
    %188 = vector.broadcast %cst_78 : f32 to vector<1x1xf32>
    %189 = arith.mulf %185, %188 : vector<1x1xf32>
    %190 = arith.mulf %187, %187 : vector<1x1xf32>
    %191 = arith.subf %189, %190 : vector<1x1xf32>
    %cst_79 = arith.constant 0.000000e+00 : f32
    %192 = vector.broadcast %cst_79 : f32 to vector<1x1xf32>
    %193 = arith.maximumf %191, %192 : vector<1x1xf32>
    %194 = vector.broadcast %187 : vector<1x1xf32> to vector<8x8xf32>
    %195 = arith.subf %176, %194 : vector<8x8xf32>
    %cst_80 = arith.constant 9.99999974E-6 : f32
    %196 = vector.broadcast %cst_80 : f32 to vector<1x1xf32>
    %197 = arith.addf %193, %196 : vector<1x1xf32>
    %198 = math.rsqrt %197 : vector<1x1xf32>
    %199 = vector.broadcast %198 : vector<1x1xf32> to vector<8x8xf32>
    %200 = arith.mulf %195, %199 : vector<8x8xf32>
    %cst_81 = arith.constant dense<0xFF800000> : vector<8xf32>
    %201 = vector.multi_reduction <maximumf>, %200, %cst_81 [1] : vector<8x8xf32> to vector<8xf32>
    %202 = vector.shape_cast %201 : vector<8xf32> to vector<8x1xf32>
    %203 = vector.broadcast %202 : vector<8x1xf32> to vector<8x8xf32>
    %204 = arith.subf %200, %203 : vector<8x8xf32>
    %205 = math.exp %204 : vector<8x8xf32>
    %206 = arith.mulf %205, %126 : vector<8x8xf32>
    %cst_82 = arith.constant dense<0.000000e+00> : vector<8xf32>
    %207 = vector.multi_reduction <add>, %206, %cst_82 [1] : vector<8x8xf32> to vector<8xf32>
    %208 = vector.shape_cast %207 : vector<8xf32> to vector<8x1xf32>
    %cst_83 = arith.constant 9.99999993E-9 : f32
    %209 = vector.broadcast %cst_83 : f32 to vector<8x1xf32>
    %210 = arith.addf %208, %209 : vector<8x1xf32>
    %211 = tpu.reciprocal %210 {approx = true} : vector<8x1xf32> -> vector<8x1xf32>
    %212 = vector.broadcast %211 : vector<8x1xf32> to vector<8x8xf32>
    %213 = arith.mulf %206, %212 : vector<8x8xf32>
    %214 = arith.mulf %173, %213 : vector<8x8xf32>
    %215 = math.sqrt %3 : vector<8x8xf32>
    %cst_84 = arith.constant 9.99999993E-9 : f32
    %216 = vector.broadcast %cst_84 : f32 to vector<8x8xf32>
    %217 = arith.addf %215, %216 : vector<8x8xf32>
    %218 = tpu.reciprocal %217 {approx = true} : vector<8x8xf32> -> vector<8x8xf32>
    %219 = arith.mulf %218, %126 : vector<8x8xf32>
    %cst_85 = arith.constant dense<0.000000e+00> : vector<8xf32>
    %220 = vector.multi_reduction <add>, %219, %cst_85 [1] : vector<8x8xf32> to vector<8xf32>
    %221 = vector.shape_cast %220 : vector<8xf32> to vector<8x1xf32>
    %cst_86 = arith.constant 9.99999993E-9 : f32
    %222 = vector.broadcast %cst_86 : f32 to vector<8x1xf32>
    %223 = arith.addf %221, %222 : vector<8x1xf32>
    %224 = tpu.reciprocal %223 {approx = true} : vector<8x1xf32> -> vector<8x1xf32>
    %225 = vector.broadcast %224 : vector<8x1xf32> to vector<8x8xf32>
    %226 = arith.mulf %219, %225 : vector<8x8xf32>
    %227 = arith.mulf %226, %214 : vector<8x8xf32>
    %cst_87 = arith.constant dense<0.000000e+00> : vector<8xf32>
    %228 = vector.multi_reduction <add>, %227, %cst_87 [1] : vector<8x8xf32> to vector<8xf32>
    %229 = vector.shape_cast %228 : vector<8xf32> to vector<8x1xf32>
    %cst_88 = arith.constant 9.99999993E-9 : f32
    %230 = vector.broadcast %cst_88 : f32 to vector<8x1xf32>
    %231 = arith.addf %229, %230 : vector<8x1xf32>
    %232 = tpu.reciprocal %231 {approx = true} : vector<8x1xf32> -> vector<8x1xf32>
    %233 = vector.broadcast %232 : vector<8x1xf32> to vector<8x8xf32>
    %234 = arith.mulf %227, %233 : vector<8x8xf32>
    %235 = vector.broadcast %117 : vector<8x1xf32> to vector<8x8xf32>
    %236 = arith.mulf %234, %235 : vector<8x8xf32>
    %237 = vector.shape_cast %236 : vector<8x8xf32> to vector<8x8x1xf32>
    %238 = vector.shape_cast %98 : vector<64x64xf32> to vector<8x8x64xf32>
    %239 = vector.broadcast %237 : vector<8x8x1xf32> to vector<8x8x64xf32>
    %240 = arith.mulf %239, %238 : vector<8x8x64xf32>
    %cst_89 = arith.constant dense<0.000000e+00> : vector<8x64xf32>
    %241 = vector.multi_reduction <add>, %240, %cst_89 [1] : vector<8x8x64xf32> to vector<8x64xf32>
    %242 = vector.extract_strided_slice %70 {offsets = [0, 64], sizes = [64, 32], strides = [1, 1]} : vector<64x96xf32> to vector<64x32xf32>
    %243 = vector.shape_cast %242 : vector<64x32xf32> to vector<8x8x32xf32>
    %cst_90 = arith.constant dense<0xFF800000> : vector<8x32xf32>
    %244 = vector.multi_reduction <maximumf>, %243, %cst_90 [1] : vector<8x8x32xf32> to vector<8x32xf32>
    %c0_91 = arith.constant 0 : index
    %c0_92 = arith.constant 0 : index
    %c0_93 = arith.constant 0 : index
    %245 = vector.load %arg14[%c0_91, %c0_92, %c0_93] : memref<1x8x128xf32, #tpu.memory_space<vmem>>, vector<1x8x32xf32>
    %246 = vector.shape_cast %245 : vector<1x8x32xf32> to vector<8x32xf32>
    %247 = vector.shape_cast %244 : vector<8x32xf32> to vector<1x8x32xf32>
    tpu.vector_store %arg14[%c0_91, %c0_92, %c0_93], %247 {strides = array<i32>} : memref<1x8x128xf32, #tpu.memory_space<vmem>>, vector<1x8x32xf32>,
    %c0_94 = arith.constant 0 : index
    %c0_95 = arith.constant 0 : index
    %c32 = arith.constant 32 : index
    %248 = vector.load %arg14[%c0_94, %c0_95, %c32] : memref<1x8x128xf32, #tpu.memory_space<vmem>>, vector<1x8x64xf32>
    %249 = vector.shape_cast %248 : vector<1x8x64xf32> to vector<8x64xf32>
    %250 = vector.shape_cast %241 : vector<8x64xf32> to vector<1x8x64xf32>
    tpu.vector_store %arg14[%c0_94, %c0_95, %c32], %250 {strides = array<i32>} : memref<1x8x128xf32, #tpu.memory_space<vmem>>, vector<1x8x64xf32>,
    %cst_96 = arith.constant 0.000000e+00 : f32
    %251 = vector.broadcast %cst_96 : f32 to vector<8x32xf32>
    %c0_97 = arith.constant 0 : index
    %c0_98 = arith.constant 0 : index
    %c96 = arith.constant 96 : index
    %252 = vector.load %arg14[%c0_97, %c0_98, %c96] : memref<1x8x128xf32, #tpu.memory_space<vmem>>, vector<1x8x32xf32>
    %253 = vector.shape_cast %252 : vector<1x8x32xf32> to vector<8x32xf32>
    %254 = vector.shape_cast %251 : vector<8x32xf32> to vector<1x8x32xf32>
    tpu.vector_store %arg14[%c0_97, %c0_98, %c96], %254 {strides = array<i32>} : memref<1x8x128xf32, #tpu.memory_space<vmem>>, vector<1x8x32xf32>,
    return
  }
  func.func @transform_0(%arg0: i32) -> (i32, i32, i32) {
    %c0_i32 = arith.constant 0 : i32
    %c0_i32_0 = arith.constant 0 : i32
    %c0_i32_1 = arith.constant 0 : i32
    return %arg0, %c0_i32, %c0_i32_0 : i32, i32, i32
  }
  func.func @transform_1(%arg0: i32) -> (i32, i32, i32) {
    %c0_i32 = arith.constant 0 : i32
    %c0_i32_0 = arith.constant 0 : i32
    %c0_i32_1 = arith.constant 0 : i32
    return %arg0, %c0_i32, %c0_i32_0 : i32, i32, i32
  }
  func.func @transform_2(%arg0: i32) -> (i32, i32, i32) {
    %c0_i32 = arith.constant 0 : i32
    %c0_i32_0 = arith.constant 0 : i32
    %c0_i32_1 = arith.constant 0 : i32
    return %arg0, %c0_i32, %c0_i32_0 : i32, i32, i32
  }
  func.func @transform_3(%arg0: i32) -> (i32, i32, i32) {
    %c0_i32 = arith.constant 0 : i32
    %c0_i32_0 = arith.constant 0 : i32
    %c0_i32_1 = arith.constant 0 : i32
    return %arg0, %c0_i32, %c0_i32_0 : i32, i32, i32
  }
  func.func @transform_4(%arg0: i32) -> (i32, i32) {
    %c0_i32 = arith.constant 0 : i32
    %c0_i32_0 = arith.constant 0 : i32
    %c0_i32_1 = arith.constant 0 : i32
    return %c0_i32, %c0_i32_0 : i32, i32
  }
  func.func @transform_5(%arg0: i32) -> (i32, i32) {
    %c0_i32 = arith.constant 0 : i32
    %c0_i32_0 = arith.constant 0 : i32
    %c0_i32_1 = arith.constant 0 : i32
    return %c0_i32, %c0_i32_0 : i32, i32
  }
  func.func @transform_6(%arg0: i32) -> (i32, i32) {
    %c0_i32 = arith.constant 0 : i32
    %c0_i32_0 = arith.constant 0 : i32
    %c0_i32_1 = arith.constant 0 : i32
    return %c0_i32, %c0_i32_0 : i32, i32
  }
  func.func @transform_7(%arg0: i32) -> (i32, i32) {
    %c0_i32 = arith.constant 0 : i32
    %c0_i32_0 = arith.constant 0 : i32
    %c0_i32_1 = arith.constant 0 : i32
    return %c0_i32, %c0_i32_0 : i32, i32
  }
  func.func @transform_8(%arg0: i32) -> (i32, i32) {
    %c0_i32 = arith.constant 0 : i32
    %c0_i32_0 = arith.constant 0 : i32
    %c0_i32_1 = arith.constant 0 : i32
    return %c0_i32, %c0_i32_0 : i32, i32
  }
  func.func @transform_9(%arg0: i32) -> (i32, i32) {
    %c0_i32 = arith.constant 0 : i32
    %c0_i32_0 = arith.constant 0 : i32
    %c0_i32_1 = arith.constant 0 : i32
    return %c0_i32, %c0_i32_0 : i32, i32
  }
  func.func @transform_10(%arg0: i32) -> (i32, i32) {
    %c0_i32 = arith.constant 0 : i32
    %c0_i32_0 = arith.constant 0 : i32
    %c0_i32_1 = arith.constant 0 : i32
    return %c0_i32, %c0_i32_0 : i32, i32
  }
  func.func @transform_11(%arg0: i32) -> (i32, i32) {
    %c0_i32 = arith.constant 0 : i32
    %c0_i32_0 = arith.constant 0 : i32
    %c0_i32_1 = arith.constant 0 : i32
    return %c0_i32, %c0_i32_0 : i32, i32
  }
  func.func @transform_12(%arg0: i32) -> (i32, i32) {
    %c0_i32 = arith.constant 0 : i32
    %c0_i32_0 = arith.constant 0 : i32
    %c0_i32_1 = arith.constant 0 : i32
    return %c0_i32, %c0_i32_0 : i32, i32
  }
  func.func @transform_13(%arg0: i32) -> (i32, i32, i32) {
    %c0_i32 = arith.constant 0 : i32
    %c0_i32_0 = arith.constant 0 : i32
    %c0_i32_1 = arith.constant 0 : i32
    return %arg0, %c0_i32, %c0_i32_0 : i32, i32, i32
  }
}

</mosaic_0001>

<bundles_post_ra>
// kernel: tpu_custom_call.1
= control target key start
LH: loop header
LB: loop body
LE: loop exit
PB: predicated region body
PF: predicated region fallthrough
CT: control target
= control target key end

     0   :  { %s2974_s0 = inlined_call_operand.vmem [shape: bf16[2,64,19], index: 0, kind: input, shape index: {}]   ;;  %s2975_s1 = inlined_call_operand.vmem [shape: f32[2,8,8], index: 1, kind: input, shape index: {}]   ;;  %s2976_s2 = inlined_call_operand.vmem [shape: bf16[2,8,16], index: 2, kind: input, shape index: {}]   ;;  %s2977_s3 = inlined_call_operand.vmem [shape: f32[2,8,8], index: 3, kind: input, shape index: {}]   ;;  %s2978_s4 = inlined_call_operand.vmem [shape: bf16[16,32], index: 4, kind: input, shape index: {}]   ;;  %s2979_s5 = inlined_call_operand.vmem [shape: f32[1,32], index: 5, kind: input, shape index: {}]   ;;  %s2980_s6 = inlined_call_operand.vmem [shape: bf16[19,96], index: 6, kind: input, shape index: {}]   ;;  %s2981_s7 = inlined_call_operand.vmem [shape: f32[1,96], index: 7, kind: input, shape index: {}]   ;;  %s2982_s8 = inlined_call_operand.vmem [shape: f32[96,66], index: 8, kind: input, shape index: {}]   ;;  %s2983_s9 = inlined_call_operand.vmem [shape: f32[1,64], index: 9, kind: input, shape index: {}]   ;;  %s2984_s10 = inlined_call_operand.vmem [shape: f32[1,32], index: 10, kind: input, shape index: {}]   ;;  %s2985_s11 = inlined_call_operand.<no memory space> [shape: f32[1,1], index: 11, kind: input, shape index: {}]   ;;  %s2986_s13 = inlined_call_operand.hbm [shape: f32[2,8,128], index: 13, kind: output, shape index: {}]   ;;  %s2987_s12 = inlined_call_operand.<no memory space> [shape: f32[1,1], index: 12, kind: input, shape index: {}]  }
   0x1   :  { %2989 = sst [smem:[#allocation7_spill]] %s2978_s4  ;;  %v18_v0 = vstv %s2985_s11  ;;  %v20_v1 = vstv %s2987_s12 }
   0x2   :  { %19 = vst [vmem:[#allocation2] sm:$0x1] %v18_v0 }
   0x3   :  { %21 = vst [vmem:[#allocation3] sm:$0x1] %v20_v1 }
   0x4   :  { %22 = vsyncpa [#allocation5], 0 }
   0x5   :  { %24 = vsyncpa [#allocation5 + $0x1], 0  ;;  %s2217_s29 = smov 0   ;;  %s2219_s30 = smov 0  }
   0x6   :  { %s2221_s14 = smov 0   ;;  %s2223_s15 = smov 0  }
   0x7 LB: > { %s2238_s11 = sadd.s32 4294967295, %s2134_s15   ;;  %s1898_s12 = sadd.s32 4294967294, %s2134_s15   ;;  %s2134_s15 = sphi %s2223_s15, %s3006_s15   ;;  %s2130_s14 = sphi %s2221_s14, %s3005_s14   ;;  %s2126_s30 = sphi %s2219_s30, %s3004_s30   ;;  %s2122_s29 = sphi %s2217_s29, %s3003_s29  }
   0x8   : > { %s2242_s16 = sadd.s32 1, %s2134_s15   ;;  %s330_s17 = sadd.s32 1, %s2130_s14 }
   0x9   : > { %s327_s18 = ssub.s32 %s2134_s15, %s2242_s16  ;;  %p340_p0 = scmp.ne.s32.totalorder %s2130_s14, %s2126_s30 }
   0xa   : > { %p328_p1 = scmp.eq.s32.totalorder %s327_s18, 0  ;;  %p341_p2 = scmp.eq.s32.totalorder %s2238_s11, 1 }
   0xb   : > { %p346_p3 = scmp.ne.s32.totalorder %s2126_s30, %s2122_s29  ;;  %p347_p4 = scmp.eq.s32.totalorder %s1898_s12, 1 }
   0xc   : > { %s2253_s19 = scalar_select %p328_p1, %s2130_s14, %s330_s17  }
   0xd   : > { %p2255_p5 = por %p341_p2, %p340_p0  ;;  %p2259_p6 = por %p347_p4, %p346_p3 }
   0xe   : > { %p1901_p7 = scmp.ge.s32.totalorder %s2134_s15, 1  ;;  %p421_p8 = scmp.lt.s32.totalorder %s2134_s15, 3 }
  0x10   : > { %p422_p9 = pnand %p1901_p7, %p421_p8 }
  0x11   : > { %s2992_s4 = sld [smem:[#allocation7_spill]] (!%p422_p9)  ;;  %p477_p10 = scmp.lt.s32.totalorder (!%p422_p9), %s2238_s11, 1 }
  0x12   : > { %425 = sbr.rel (%p422_p9) target bundleno = 1765 (0x6e5), region = 72  ;;  %s1947_s12 = sshll.u32 (!%p422_p9), %s2238_s11, 3 }
  0x13   : > { %s1798_s22 = scalar_lea.hbm (!%p422_p9), %s2986_s13, %s1947_s12  ;;  %s2092_s17 = scalar_lea.hbm (!%p422_p9), %s2986_s13, 16 }
  0x17   : > { %v1955_v2 = vld [vmem:[%s2992_s4] sm:$0xff]  ;;  %v572_v3 = vld [vmem:[%s2980_s6 + $0x8] sm:$0x3]  ;;  %vm619_vm0 = vcmask 1040384   ;;  %vm620_vm1 = vcmask 1041408   ;;  %s2273_s26 = scalar_select %p477_p10, %s2238_s11, 1  ;;  %v655_v19 = vlaneseq }
  0x18   : > { %v602_v4 = vunpack.c.l.b16 %v572_v3  ;;  %529 = vmatpush.bf16.msra.mxu0 %v1955_v2  ;;  %v2136_v5 = vmov 65535   ;;  %vm518_vm2 = vcmask 130048   ;;  %v1956_v11 = vld [vmem:[%s2980_s6] sm:$0xff]  ;;  %vm606_vm3 = vcmask 154624   ;;  %v772_v1 = vld [vmem:[%s2982_s8 + $0x58] sm:$0xff]  ;;  %v766_v29 = vld [vmem:[%s2982_s8 + $0x28] sm:$0xff] }
  0x19   : > { %v621_v6 = vsel %vm619_vm0, 4294967295, %v2136_v5  ;;  %s1950_s27 = sshll.u32 %s2273_s26, 5  ;;  %s1906_s28 = sshll.u32 %s2273_s26, 2  ;;  %v2291_v21 = vld [vmem:[%s2981_s7] ss:$0 sm:$0xff]  ;;  %v2294_v23 = vand.u32 127, %v655_v19  ;;  %801 = vmatpush.msra.mxu2 %v772_v1  ;;  %1959 = vmatpush.msra.mxu3 %v772_v1 }
  0x1a   : > { %v604_v7 = vpack.c.b16 %v602_v4, %v602_v4  ;;  %v622_v8 = vsel %vm620_vm1, %v621_v6, 0  ;;  %s489_s18 = scalar_lea.vmem %s2976_s2, %s1906_s28  ;;  %s481_s24 = scalar_lea.vmem %s2974_s0, %s1950_s27  ;;  %vm678_vm7 = vcmask 785408   ;;  %v771_v6 = vld [vmem:[%s2982_s8 + $0x50] sm:$0xff]  ;;  %vm1689_vm10 = vcmask 785920  }
  0x1b   : > { %v504_v10 = vld [vmem:[%s489_s18] sm:$0xf]  ;;  %v1952_v12 = vld [vmem:[%s481_s24 + $0x8] sm:$0xff]  ;;  %v1953_v14 = vld [vmem:[%s481_s24 + $0x10] sm:$0xff]  ;;  %vm657_vm4 = vcmp.lt.s32.totalorder %v2294_v23, 32  ;;  %vm658_vm5 = vcmp.ge.s32.totalorder %v2294_v23, 64  ;;  %802 = vmatpush.msra.mxu2 %v771_v6  ;;  %1960 = vmatpush.msra.mxu3 %v771_v6 }
  0x1c   : > { %v624_v9 = vand.u32 %v622_v8, %v604_v7  ;;  %1912 = vmatmul.msk.bf16.vlgmr.msra.gmra.mxu0 %vm518_vm2, %v504_v10  ;;  %v1951_v13 = vld [vmem:[%s481_s24] sm:$0xff]  ;;  %v1954_v15 = vld [vmem:[%s481_s24 + $0x18] sm:$0xff]  ;;  %vm2300_vm6 = vmor %vm657_vm4, %vm658_vm5  ;;  %vm1077_vm12 = vcmask 1041409   ;;  %vm1079_vm13 = vcmask 1042434   ;;  %vm1081_vm14 = vcmask 1043459   ;;  %s2137_s24 = smov 64  }
  0x1d   : > { %v770_v10 = vld [vmem:[%s2982_s8 + $0x48] sm:$0xff]  ;;  %vm1083_vm15 = vcmask 1044484   ;;  %vm1085_vm0 = vcmask 1045509   ;;  %vm1087_vm1 = vcmask 1046534   ;;  %vm1089_vm2 = vcmask 1047559   ;;  %s1905_s25 = sshll.u32 %s2273_s26, 3 }
  0x1e   : > { %1957 = vmatpush.bf16.msra.mxu1 %v624_v9  ;;  %632 = vmatpush.bf16.msrb.mxu0 %v624_v9  ;;  %s493_s28 = scalar_lea.vmem %s2977_s3, %s1905_s25  ;;  %s485_s27 = scalar_lea.vmem %s2975_s1, %s1905_s25 }
  0x1f   : > { %803 = vmatpush.msra.mxu2 %v770_v10  ;;  %1961 = vmatpush.msra.mxu3 %v770_v10  ;;  %s474_s26 = sand.u32 1, %s2126_s30   ;;  %s1802_s4 = sshll.u32 %s1798_s22, 4  ;;  %s1803_s4 = int_to_ptr.hbm [resolvable:$true] %s1802_s4 }
  0x22   : > { %1958 = vmatpush.bf16.msra.mxu1 %v1956_v11  ;;  %633 = vmatpush.bf16.msrb.mxu0 %v1956_v11 }
  0x25   : > { %1934 = vmatmul.msk.bf16.vlgmr.msra.gmra.mxu1 %vm606_vm3, %v1952_v12 }
  0x2c   : > { %1933 = vmatmul.msk.bf16.vlgmr.msrb.gmra.mxu0 %vm606_vm3, %v1951_v13 }
  0x35   : > { %1935 = vmatmul.msk.bf16.gmra.mxu1 %vm606_vm3, %v1953_v14 }
  0x45   : > { %1936 = vmatmul.msk.bf16.gmra.mxu1 %vm606_vm3, %v1954_v15  ;;  %vm2988_vm3 = vcmask 523264  }
  0x99   : > { %v2286_v16 = vpop.f32.mrf.mxu0 }
  0xa1   : > { %v533_v18 = vpop.f32.mrf.mxu0 }
  0xa2   : > { %v640_v17 = vpop.f32.mrf.mxu1  ;;  %v769_v18 = vld [vmem:[%s2982_s8 + $0x40] sm:$0xff] }
  0xa3   : > { %v641_v27 = vadd.f32 %v2291_v21, %v640_v17  ;;  %804 = vmatpush.msra.mxu2 %v769_v18  ;;  %1962 = vmatpush.msra.mxu3 %v769_v18 }
  0xa5   : > { %v662_v33 = vmax.f32 %v641_v27, 0.0 }
  0xa7   : > { %v2324_v41 = vsel %vm2300_vm6, %v662_v33, %v641_v27 }
  0xa8   : > { %v703_v48 = vmul.f32 %v2324_v41, %v2324_v41  ;;  %v682_v52 = vsel %vm678_vm7, %v2324_v41, 0.0 }
  0xa9   : > { %v635_v22 = vpop.f32.mrf.mxu0 }
  0xaa   : > { %v642_v20 = vpop.f32.mrf.mxu1  ;;  %v636_v24 = vadd.f32 %v2291_v21, %v635_v22  ;;  %v712_v55 = vsel %vm678_vm7, %v703_v48, 0.0 }
  0xab   : > { %v643_v34 = vadd.f32 %v2291_v21, %v642_v20 }
  0xac   : > { %v660_v25 = vmax.f32 %v636_v24, 0.0 }
  0xad   : > { %v663_v42 = vmax.f32 %v643_v34, 0.0 }
  0xae   : > { %v2307_v31 = vsel %vm2300_vm6, %v660_v25, %v636_v24 }
  0xaf   : > { %v701_v35 = vmul.f32 %v2307_v31, %v2307_v31  ;;  %v679_v38 = vsel %vm678_vm7, %v2307_v31, 0.0  ;;  %v2334_v49 = vsel %vm2300_vm6, %v663_v42, %v643_v34  ;;  %v765_v42 = vld [vmem:[%s2982_s8 + $0x20] sm:$0xff] }
  0xb0   : > { %v704_v56 = vmul.f32 %v2334_v49, %v2334_v49  ;;  %v684_v61 = vsel %vm678_vm7, %v2334_v49, 0.0 }
  0xb1   : > { %v637_v28 = vpop.f32.mrf.mxu0  ;;  %v709_v44 = vsel %vm678_vm7, %v701_v35, 0.0 }
  0xb2   : > { %v645_v26 = vpop.f32.mrf.mxu1  ;;  %v638_v30 = vadd.f32 %v2291_v21, %v637_v28  ;;  %v714_v2 = vsel %vm678_vm7, %v704_v56, 0.0 }
  0xb3   : > { %v646_v43 = vadd.f32 %v2291_v21, %v645_v26  ;;  %v768_v26 = vld [vmem:[%s2982_s8 + $0x38] sm:$0xff] }
  0xb4   : > { %v661_v32 = vmax.f32 %v638_v30, 0.0  ;;  %805 = vmatpush.msra.mxu2 %v768_v26  ;;  %1963 = vmatpush.msra.mxu3 %v768_v26 }
  0xb5   : > { %v664_v50 = vmax.f32 %v646_v43, 0.0 }
  0xb6   : > { %v2314_v36 = vsel %vm2300_vm6, %v661_v32, %v638_v30  ;;  %v767_v32 = vld [vmem:[%s2982_s8 + $0x30] sm:$0xff] }
  0xb7   : > { %v702_v37 = vmul.f32 %v2314_v36, %v2314_v36  ;;  %v680_v39 = vsel %vm678_vm7, %v2314_v36, 0.0  ;;  %v2343_v58 = vsel %vm2300_vm6, %v664_v50, %v646_v43  ;;  %806 = vmatpush.msra.mxu2 %v767_v32  ;;  %1964 = vmatpush.msra.mxu3 %v767_v32  ;;  %v764_v43 = vld [vmem:[%s2982_s8 + $0x18] sm:$0xff]  ;;  %v762_v50 = vld [vmem:[%s2982_s8 + $0x8] sm:$0xff] }
  0xb8   : > { %v681_v46 = vadd.f32 %v680_v39, %v679_v38  ;;  %v705_v3 = vmul.f32 %v2343_v58, %v2343_v58  ;;  %v686_v7 = vsel %vm678_vm7, %v2343_v58, 0.0 }
  0xb9   : > { %v710_v45 = vsel %vm678_vm7, %v702_v37, 0.0  ;;  %807 = vmatpush.msra.mxu2 %v766_v29  ;;  %1965 = vmatpush.msra.mxu3 %v766_v29 }
  0xba   : > { %v647_v40 = vpop.f32.mrf.mxu1  ;;  %v711_v51 = vadd.f32 %v710_v45, %v709_v44  ;;  %v683_v53 = vadd.f32 %v682_v52, %v681_v46  ;;  %v716_v11 = vsel %vm678_vm7, %v705_v3, 0.0  ;;  %v763_v46 = vld [vmem:[%s2982_s8 + $0x10] sm:$0xff] }
  0xbb   : > { %v648_v47 = vadd.f32 %v2291_v21, %v647_v40  ;;  %808 = vmatpush.msra.mxu2 %v765_v42  ;;  %1966 = vmatpush.msra.mxu3 %v765_v42 }
  0xbc   : > { %v713_v59 = vadd.f32 %v712_v55, %v711_v51  ;;  %v685_v63 = vadd.f32 %v684_v61, %v683_v53  ;;  %v761_v53 = vld [vmem:[%s2982_s8] sm:$0xff] }
  0xbd   : > { %v665_v54 = vmax.f32 %v648_v47, 0.0  ;;  %809 = vmatpush.msra.mxu2 %v764_v43  ;;  %1967 = vmatpush.msra.mxu3 %v764_v43 }
  0xbe   : > { %v715_v4 = vadd.f32 %v714_v2, %v713_v59  ;;  %v687_v9 = vadd.f32 %v686_v7, %v685_v63 }
  0xbf   : > { %v2350_v62 = vsel %vm2300_vm6, %v665_v54, %v648_v47  ;;  %810 = vmatpush.msra.mxu2 %v763_v46  ;;  %1968 = vmatpush.msra.mxu3 %v763_v46 }
  0xc0   : > { %v706_v8 = vmul.f32 %v2350_v62, %v2350_v62  ;;  %v688_v12 = vsel %vm678_vm7, %v2350_v62, 0.0  ;;  %v717_v15 = vadd.f32 %v716_v11, %v715_v4 }
  0xc1   : > { %v689_v24 = vadd.f32 %v688_v12, %v687_v9  ;;  %811 = vmatpush.msra.mxu2 %v762_v50  ;;  %1969 = vmatpush.msra.mxu3 %v762_v50 }
  0xc2   : > { %v650_v57 = vpop.f32.mrf.mxu1  ;;  %v718_v20 = vsel %vm678_vm7, %v706_v8, 0.0 }
  0xc3   : > { %v651_v60 = vadd.f32 %v2291_v21, %v650_v57  ;;  %812 = vmatpush.msra.mxu2 %v761_v53  ;;  %1970 = vmatpush.msra.mxu3 %v761_v53 }
  0xc5   : > { %v666_v0 = vmax.f32 %v651_v60, 0.0 }
  0xc7   : > { %v2360_v5 = vsel %vm2300_vm6, %v666_v0, %v651_v60 }
  0xc8   : > { %v707_v13 = vmul.f32 %v2360_v5, %v2360_v5  ;;  %v690_v22 = vsel %vm678_vm7, %v2360_v5, 0.0 }
  0xc9   : > { %v691_v28 = vadd.f32 %v690_v22, %v689_v24 }
  0xca   : > { %v652_v14 = vpop.f32.mrf.mxu1  ;;  %v720_v27 = vsel %vm678_vm7, %v707_v13, 0.0 }
  0xcb   : > { %v653_v17 = vadd.f32 %v2291_v21, %v652_v14  ;;  %v719_v21 = vadd.f32 %v718_v20, %v717_v15 }
  0xcd   : > { %v667_v25 = vmax.f32 %v653_v17, 0.0  ;;  %v721_v35 = vadd.f32 %v720_v27, %v719_v21 }
  0xcf   : > { %v2390_v30 = vsel %vm2300_vm6, %v667_v25, %v653_v17 }
  0xd0   : > { %v692_v33 = vsel %vm678_vm7, %v2390_v30, 0.0  ;;  %v708_v34 = vmul.f32 %v2390_v30, %v2390_v30 }
  0xd1   : > { %v693_v37 = vadd.f32 %v692_v33, %v691_v28 }
  0xd2   : > { %v722_v38 = vsel %vm678_vm7, %v708_v34, 0.0 }
  0xd3   : > { %v694_v39 = vrot.slane %v693_v37, 4  ;;  %v723_v40 = vadd.f32 %v722_v38, %v721_v35 }
  0xd5   : > { %v695_v44 = vadd.f32 %v694_v39, %v693_v37  ;;  %v724_v45 = vrot.slane %v723_v40, 4 }
  0xd7   : > { %v696_v47 = vrot.slane %v695_v44, 2  ;;  %v725_v48 = vadd.f32 %v724_v45, %v723_v40 }
  0xd9   : > { %v697_v51 = vadd.f32 %v696_v47, %v695_v44  ;;  %v726_v52 = vrot.slane %v725_v48, 2 }
  0xdb   : > { %v698_v54 = vrot.slane %v697_v51, 1  ;;  %v727_v55 = vadd.f32 %v726_v52, %v725_v48 }
  0xdd   : > { %v699_v56 = vadd.f32 %v698_v54, %v697_v51  ;;  %v728_v57 = vrot.slane %v727_v55, 1 }
  0xdf   : > { %v700_v59 = vmul.f32 0.015625, %v699_v56  ;;  %v729_v60 = vadd.f32 %v728_v57, %v727_v55 }
  0xe1   : > { %v730_v61 = vmul.f32 0.015625, %v729_v60  ;;  %v731_v63 = vmul.f32 %v700_v59, %v700_v59  ;;  %v734_v9 = vsub.f32 %v2307_v31, %v700_v59  ;;  %v738_v11 = vsub.f32 %v2343_v58, %v700_v59 }
  0xe2   : > { %v735_v12 = vsub.f32 %v2314_v36, %v700_v59  ;;  %v739_v13 = vsub.f32 %v2350_v62, %v700_v59  ;;  %v736_v14 = vsub.f32 %v2324_v41, %v700_v59  ;;  %v740_v17 = vsub.f32 %v2360_v5, %v700_v59 }
  0xe3   : > { %v732_v0 = vsub.f32 %v730_v61, %v731_v63  ;;  %v737_v18 = vsub.f32 %v2334_v49, %v700_v59  ;;  %v741_v20 = vsub.f32 %v2390_v30, %v700_v59 }
  0xe5   : > { %v733_v1 = vmax.f32 %v732_v0, 0.0 }
  0xe7   : > { %v742_v2 = vadd.f32 1e-05, %v733_v1 }
  0xe9   : > { %2030 = vrsqrt.f32 %v742_v2  ;;  %vm749_vm9 = vweird.f32 %v742_v2 }
  0xef   : > { %v2031_v3 = vpop.eup %2030 }
  0xf0   : > { %v744_v4 = vmul.f32 %v2031_v3, %v742_v2  ;;  %vm750_vm8 = vweird.f32 %v2031_v3 }
  0xf1   : > { %vm751_vm11 = vmor %vm749_vm9, %vm750_vm8  ;;  %vm941_vm8 = vcmp.eq.s32.totalorder %v2294_v23, 0  ;;  %vm982_vm9 = vcmask 15360  }
  0xf2   : > { %v745_v6 = vmul.f32 %v2031_v3, %v744_v4 }
  0xf4   : > { %v746_v7 = vmul.f32 0.5, %v745_v6 }
  0xf6   : > { %v747_v8 = vsub.f32 1.5, %v746_v7 }
  0xf8   : > { %v748_v10 = vmul.f32 %v2031_v3, %v747_v8 }
  0xfa   : > { %v752_v15 = vsel %vm751_vm11, %v2031_v3, %v748_v10  ;;  %vm536_vm11 = vcmask 261120  }
  0xfb   : > { %v753_v31 = vmul.f32 %v752_v15, %v734_v9  ;;  %v757_v22 = vmul.f32 %v752_v15, %v738_v11  ;;  %v754_v24 = vmul.f32 %v752_v15, %v735_v12  ;;  %v758_v25 = vmul.f32 %v752_v15, %v739_v13 }
  0xfc   : > { %v2426_v26 = vmul.f32 %v752_v15, %v736_v14  ;;  %v2428_v58 = vmul.f32 %v752_v15, %v740_v17  ;;  %v2430_v36 = vmul.f32 %v752_v15, %v737_v18  ;;  %v2432_v62 = vmul.f32 %v752_v15, %v741_v20 }
  0xfd   : > { %1937 = vmatmul.msk.f32.vlgmr.msra.gmra.mxu2 %vm678_vm7, %v753_v31  ;;  %v1690_v41 = vsel %vm1689_vm10, %v753_v31, -inf  ;;  %1941 = vmatmul.msk.f32.vlgmr.msra.gmra.mxu3 %vm678_vm7, %v757_v22  ;;  %v1718_v49 = vsel %vm1689_vm10, %v757_v22, -inf  ;;  %v1697_v5 = vsel %vm1689_vm10, %v754_v24, -inf  ;;  %v1725_v27 = vsel %vm1689_vm10, %v758_v25, -inf }
  0xfe   : > { %v1691_v21 = vrot.slane %v1690_v41, 4  ;;  %v1719_v28 = vrot.slane %v1718_v49, 4  ;;  %v1698_v30 = vrot.slane %v1697_v5, 4  ;;  %v1726_v32 = vrot.slane %v1725_v27, 4 }
  0xff   : > { %v1704_v33 = vsel %vm1689_vm10, %v2426_v26, -inf  ;;  %v1732_v34 = vsel %vm1689_vm10, %v2428_v58, -inf  ;;  %v1711_v35 = vsel %vm1689_vm10, %v2430_v36, -inf  ;;  %v1739_v37 = vsel %vm1689_vm10, %v2432_v62, -inf }
 0x100   : > { %v1692_v29 = vmax.f32 %v1690_v41, %v1691_v21  ;;  %v1720_v38 = vmax.f32 %v1718_v49, %v1719_v28  ;;  %v1699_v39 = vmax.f32 %v1697_v5, %v1698_v30  ;;  %v1727_v40 = vmax.f32 %v1725_v27, %v1726_v32 }
 0x101   : > { %v1705_v42 = vrot.slane %v1704_v33, 4  ;;  %v1733_v43 = vrot.slane %v1732_v34, 4  ;;  %v1712_v44 = vrot.slane %v1711_v35, 4  ;;  %v1740_v45 = vrot.slane %v1739_v37, 4 }
 0x102   : > { %v1693_v46 = vrot.slane %v1692_v29, 2  ;;  %v1721_v47 = vrot.slane %v1720_v38, 2  ;;  %v1700_v48 = vrot.slane %v1699_v39, 2  ;;  %v1728_v50 = vrot.slane %v1727_v40, 2 }
 0x103   : > { %v1706_v51 = vmax.f32 %v1704_v33, %v1705_v42  ;;  %v1734_v52 = vmax.f32 %v1732_v34, %v1733_v43  ;;  %v1713_v53 = vmax.f32 %v1711_v35, %v1712_v44  ;;  %v1741_v54 = vmax.f32 %v1739_v37, %v1740_v45 }
 0x104   : > { %v1694_v55 = vmax.f32 %v1692_v29, %v1693_v46  ;;  %v1722_v56 = vmax.f32 %v1720_v38, %v1721_v47  ;;  %v1701_v57 = vmax.f32 %v1699_v39, %v1700_v48  ;;  %v1729_v2 = vmax.f32 %v1727_v40, %v1728_v50 }
 0x105   : > { %1938 = vmatmul.msk.f32.gmra.mxu2 %vm678_vm7, %v754_v24  ;;  %1942 = vmatmul.msk.f32.gmra.mxu3 %vm678_vm7, %v758_v25  ;;  %v1707_v59 = vrot.slane %v1706_v51, 2  ;;  %v1735_v60 = vrot.slane %v1734_v52, 2  ;;  %v1714_v61 = vrot.slane %v1713_v53, 2  ;;  %v1742_v63 = vrot.slane %v1741_v54, 2 }
 0x106   : > { %v1695_v0 = vrot.slane %v1694_v55, 1  ;;  %v1702_v1 = vrot.slane %v1701_v57, 1  ;;  %v1723_v10 = vrot.slane %v1722_v56, 1  ;;  %v1730_v13 = vrot.slane %v1729_v2, 1 }
 0x107   : > { %v1708_v3 = vmax.f32 %v1706_v51, %v1707_v59  ;;  %v1736_v4 = vmax.f32 %v1734_v52, %v1735_v60  ;;  %v1715_v6 = vmax.f32 %v1713_v53, %v1714_v61  ;;  %v1743_v9 = vmax.f32 %v1741_v54, %v1742_v63 }
 0x108   : > { %v1696_v7 = vmax.f32 %v1694_v55, %v1695_v0  ;;  %v1703_v8 = vmax.f32 %v1701_v57, %v1702_v1  ;;  %v1724_v31 = vmax.f32 %v1722_v56, %v1723_v10  ;;  %v1731_v24 = vmax.f32 %v1729_v2, %v1730_v13 }
 0x109   : > { %v1709_v11 = vrot.slane %v1708_v3, 1  ;;  %v1716_v12 = vrot.slane %v1715_v6, 1  ;;  %v1737_v17 = vrot.slane %v1736_v4, 1  ;;  %v1744_v20 = vrot.slane %v1743_v9, 1 }
 0x10a   : > { %v1754_v14 = vsel %vm1077_vm12, %v1703_v8, %v1696_v7  ;;  %vm1040_vm10 = vcmask 64512  }
 0x10b   : > { %v1710_v15 = vmax.f32 %v1708_v3, %v1709_v11  ;;  %v1717_v18 = vmax.f32 %v1715_v6, %v1716_v12  ;;  %v1738_v41 = vmax.f32 %v1736_v4, %v1737_v17  ;;  %v1745_v5 = vmax.f32 %v1743_v9, %v1744_v20 }
 0x10d   : > { %1939 = vmatmul.msk.f32.gmra.mxu2 %vm678_vm7, %v2426_v26  ;;  %1943 = vmatmul.msk.f32.gmra.mxu3 %vm678_vm7, %v2428_v58  ;;  %v1755_v22 = vsel %vm1079_vm13, %v1710_v15, %v1754_v14  ;;  %v2026_v58 = vld [vmem:[%s2983_s9] ss:$0 sm:$0xff] }
 0x10e   : > { %v1756_v25 = vsel %vm1081_vm14, %v1717_v18, %v1755_v22 }
 0x10f   : > { %v1757_v49 = vsel %vm1083_vm15, %v1724_v31, %v1756_v25 }
 0x110   : > { %v1758_v27 = vsel %vm1085_vm0, %v1731_v24, %v1757_v49 }
 0x111   : > { %v1759_v21 = vsel %vm1087_vm1, %v1738_v41, %v1758_v27 }
 0x112   : > { %v2461_v26 = vsel %vm1089_vm2, %v1745_v5, %v1759_v21 }
 0x115   : > { %1940 = vmatmul.msk.f32.gmra.mxu2 %vm678_vm7, %v2430_v36  ;;  %1944 = vmatmul.msk.f32.gmra.mxu3 %vm678_vm7, %v2432_v62  ;;  %vm1007_vm7 = vcmp.eq.s32.totalorder %v2294_v23, 1 }
 0x180   : > { %v814_v28 = vpop.f32.mrf.mxu2  ;;  %v826_v30 = vpop.f32.mrf.mxu3 }
 0x181   : > { %958 = vrot.lane.b32.xlu2 %v826_v30, %s2137_s24  ;;  %950 = vrot.lane.b32.xlu0 %v814_v28, %s2137_s24  ;;  %v842_v32 = vadd.f32 %v2026_v58, %v814_v28  ;;  %v846_v50 = vadd.f32 %v2026_v58, %v826_v30 }
 0x183   : > { %v2472_v33 = vmax.f32 %v842_v32, 0.0  ;;  %v2497_v60 = vmax.f32 %v846_v50, 0.0 }
 0x185   : > { %v881_v62 = vmul.f32 %v2472_v33, %v2472_v33  ;;  %v859_v29 = vsel %vm2988_vm3, %v2472_v33, 0.0  ;;  %v885_v3 = vmul.f32 %v2497_v60, %v2497_v60  ;;  %v866_v9 = vsel %vm2988_vm3, %v2497_v60, 0.0 }
 0x187   : > { %v889_v42 = vsel %vm2988_vm3, %v881_v62, 0.0  ;;  %v896_v15 = vsel %vm2988_vm3, %v885_v3, 0.0  ;;  %v2138_v62 = vmov 0  }
 0x188   : > { %v817_v34 = vpop.f32.mrf.mxu2  ;;  %v829_v35 = vpop.f32.mrf.mxu3  ;;  %2015 = vset.pattern.permute.xlu2 %v2138_v62 }
 0x189   : > { %v843_v36 = vadd.f32 %v2026_v58, %v817_v34  ;;  %960 = vrot.lane.b32.xlu2 %v829_v35, %s2137_s24  ;;  %952 = vrot.lane.b32.xlu0 %v817_v34, %s2137_s24  ;;  %v847_v54 = vadd.f32 %v2026_v58, %v829_v35  ;;  %v2027_v34 = vld [vmem:[#allocation3] ss:$0 sm:$0xff] }
 0x18b   : > { %v2478_v37 = vmax.f32 %v843_v36, 0.0  ;;  %v2500_v0 = vmax.f32 %v847_v54, 0.0 }
 0x18d   : > { %v860_v38 = vsel %vm2988_vm3, %v2478_v37, 0.0  ;;  %v882_v39 = vmul.f32 %v2478_v37, %v2478_v37  ;;  %v886_v10 = vmul.f32 %v2500_v0, %v2500_v0  ;;  %v868_v17 = vsel %vm2988_vm3, %v2500_v0, 0.0 }
 0x18e   : > { %v861_v40 = vadd.f32 %v860_v38, %v859_v29 }
 0x18f   : > { %v890_v43 = vsel %vm2988_vm3, %v882_v39, 0.0  ;;  %v898_v22 = vsel %vm2988_vm3, %v886_v10, 0.0 }
 0x190   : > { %v891_v44 = vadd.f32 %v890_v43, %v889_v42  ;;  %v820_v45 = vpop.f32.mrf.mxu2  ;;  %v832_v46 = vpop.f32.mrf.mxu3 }
 0x191   : > { %v844_v47 = vadd.f32 %v2026_v58, %v820_v45  ;;  %962 = vrot.lane.b32.xlu0 %v832_v46, %s2137_s24  ;;  %954 = vrot.lane.b32.xlu1 %v820_v45, %s2137_s24  ;;  %v848_v61 = vadd.f32 %v2026_v58, %v832_v46 }
 0x192   : > { %1155 = vperm.xlu2 %2015, %v2027_v34  }
 0x193   : > { %v2490_v48 = vmax.f32 %v844_v47, 0.0  ;;  %v2506_v4 = vmax.f32 %v848_v61, 0.0 }
 0x195   : > { %v862_v51 = vsel %vm2988_vm3, %v2490_v48, 0.0  ;;  %v883_v52 = vmul.f32 %v2490_v48, %v2490_v48  ;;  %v887_v18 = vmul.f32 %v2506_v4, %v2506_v4  ;;  %v870_v24 = vsel %vm2988_vm3, %v2506_v4, 0.0 }
 0x196   : > { %v863_v53 = vadd.f32 %v862_v51, %v861_v40 }
 0x197   : > { %v892_v55 = vsel %vm2988_vm3, %v883_v52, 0.0  ;;  %v900_v5 = vsel %vm2988_vm3, %v887_v18, 0.0 }
 0x198   : > { %v893_v56 = vadd.f32 %v892_v55, %v891_v44  ;;  %v823_v57 = vpop.f32.mrf.mxu2  ;;  %v835_v59 = vpop.f32.mrf.mxu3 }
 0x199   : > { %v845_v63 = vadd.f32 %v2026_v58, %v823_v57  ;;  %956 = vrot.lane.b32.xlu1 %v823_v57, %s2137_s24  ;;  %v849_v2 = vadd.f32 %v2026_v58, %v835_v59 }
 0x19b   : > { %v2502_v1 = vmax.f32 %v845_v63, 0.0  ;;  %v2517_v12 = vmax.f32 %v849_v2, 0.0 }
 0x19d   : > { %v864_v6 = vsel %vm2988_vm3, %v2502_v1, 0.0  ;;  %v884_v7 = vmul.f32 %v2502_v1, %v2502_v1  ;;  %v888_v25 = vmul.f32 %v2517_v12, %v2517_v12  ;;  %v872_v27 = vsel %vm2988_vm3, %v2517_v12, 0.0 }
 0x19e   : > { %v865_v8 = vadd.f32 %v864_v6, %v863_v53 }
 0x19f   : > { %v894_v11 = vsel %vm2988_vm3, %v884_v7, 0.0  ;;  %v902_v28 = vsel %vm2988_vm3, %v888_v25, 0.0 }
 0x1a0   : > { %v867_v13 = vadd.f32 %v866_v9, %v865_v8  ;;  %v895_v14 = vadd.f32 %v894_v11, %v893_v56 }
 0x1a1   : > { %964 = vrot.lane.b32.xlu1 %v835_v59, %s2137_s24 }
 0x1a2   : > { %v897_v20 = vadd.f32 %v896_v15, %v895_v14  ;;  %v869_v31 = vadd.f32 %v868_v17, %v867_v13 }
 0x1a4   : > { %v871_v41 = vadd.f32 %v870_v24, %v869_v31  ;;  %v899_v49 = vadd.f32 %v898_v22, %v897_v20 }
 0x1a6   : > { %v873_v21 = vadd.f32 %v872_v27, %v871_v41  ;;  %v901_v58 = vadd.f32 %v900_v5, %v899_v49 }
 0x1a8   : > { %v874_v30 = vrot.slane %v873_v21, 4  ;;  %v903_v32 = vadd.f32 %v902_v28, %v901_v58 }
 0x1aa   : > { %v875_v35 = vadd.f32 %v874_v30, %v873_v21  ;;  %v904_v36 = vrot.slane %v903_v32, 4 }
 0x1ac   : > { %v876_v29 = vrot.slane %v875_v35, 2  ;;  %v905_v38 = vadd.f32 %v904_v36, %v903_v32 }
 0x1ae   : > { %v877_v39 = vadd.f32 %v876_v29, %v875_v35  ;;  %v906_v40 = vrot.slane %v905_v38, 2 }
 0x1b0   : > { %v878_v42 = vrot.slane %v877_v39, 1  ;;  %v907_v43 = vadd.f32 %v906_v40, %v905_v38 }
 0x1b2   : > { %v879_v44 = vadd.f32 %v878_v42, %v877_v39  ;;  %v908_v45 = vrot.slane %v907_v43, 1 }
 0x1b4   : > { %v880_v46 = vmul.f32 0.015625, %v879_v44  ;;  %v909_v47 = vadd.f32 %v908_v45, %v907_v43 }
 0x1b6   : > { %v910_v50 = vmul.f32 0.015625, %v909_v47  ;;  %v911_v51 = vmul.f32 %v880_v46, %v880_v46  ;;  %v915_v52 = vsub.f32 %v2478_v37, %v880_v46  ;;  %v916_v53 = vsub.f32 %v2490_v48, %v880_v46 }
 0x1b7   : > { %v918_v54 = vsub.f32 %v2497_v60, %v880_v46  ;;  %v920_v55 = vsub.f32 %v2506_v4, %v880_v46  ;;  %v914_v56 = vsub.f32 %v2472_v33, %v880_v46  ;;  %v917_v57 = vsub.f32 %v2502_v1, %v880_v46 }
 0x1b8   : > { %v912_v59 = vsub.f32 %v910_v50, %v911_v51  ;;  %v919_v61 = vsub.f32 %v2500_v0, %v880_v46  ;;  %v921_v63 = vsub.f32 %v2517_v12, %v880_v46 }
 0x1ba   : > { %v913_v2 = vmax.f32 %v912_v59, 0.0  ;;  %v2629_v59 = vld [vmem:[%s493_s28] sm:$0xff]  ;;  %s2140_s28 = smov 32  }
 0x1bc   : > { %v922_v3 = vadd.f32 1e-05, %v913_v2 }
 0x1be   : > { %2032 = vrsqrt.f32 %v922_v3  ;;  %vm929_vm5 = vweird.f32 %v922_v3 }
 0x1c4   : > { %v2033_v6 = vpop.eup %2032 }
 0x1c5   : > { %v924_v37 = vmul.f32 %v2033_v6, %v922_v3  ;;  %vm930_vm4 = vweird.f32 %v2033_v6 }
 0x1c6   : > { %vm931_vm6 = vmor %vm929_vm5, %vm930_vm4 }
 0x1c7   : > { %v925_v7 = vmul.f32 %v2033_v6, %v924_v37 }
 0x1c9   : > { %v926_v48 = vmul.f32 0.5, %v925_v7 }
 0x1cb   : > { %v927_v8 = vsub.f32 1.5, %v926_v48 }
 0x1cd   : > { %v928_v60 = vmul.f32 %v2033_v6, %v927_v8 }
 0x1cf   : > { %v932_v33 = vsel %vm931_vm6, %v2033_v6, %v928_v60 }
 0x1d0   : > { %v2543_v4 = vmul.f32 %v932_v33, %v915_v52  ;;  %v2545_v1 = vmul.f32 %v932_v33, %v916_v53  ;;  %v2547_v0 = vmul.f32 %v932_v33, %v918_v54  ;;  %v2549_v9 = vmul.f32 %v932_v33, %v920_v55 }
 0x1d1   : > { %v2551_v10 = vmul.f32 %v932_v33, %v914_v56  ;;  %v2553_v11 = vmul.f32 %v932_v33, %v917_v57  ;;  %v2555_v12 = vmul.f32 %v932_v33, %v919_v61  ;;  %v2557_v13 = vmul.f32 %v932_v33, %v921_v63  ;;  %v2028_v57 = vld [vmem:[#allocation2] ss:$0 sm:$0xff] }
 0x1d2   : > { %v1041_v61 = vsel %vm1040_vm10, %v2629_v59, 0.0  ;;  %v2024_v63 = vld [vmem:[%s2979_s5] ss:$0 sm:$0xff] }
 0x1d3   : > { %v532_v2 = vadd.f32 %v2024_v63, %v2286_v16 }
 0x1d5   : > { %v2637_v3 = vmax.f32 %v532_v2, 0.0 }
 0x1d7   : > { %v545_v6 = vmul.f32 %v2637_v3, %v2637_v3  ;;  %v537_v37 = vsel %vm536_vm11, %v2637_v3, 0.0 }
 0x1d8   : > { %v538_v7 = vrot.slane %v537_v37, 4 }
 0x1d9   : > { %v546_v48 = vsel %vm536_vm11, %v545_v6, 0.0 }
 0x1da   : > { %v539_v8 = vadd.f32 %v538_v7, %v537_v37  ;;  %v547_v60 = vrot.slane %v546_v48, 4 }
 0x1db   : > { %v959_v14 = vpop.permute.xlu2 %958 }
 0x1dc   : > { %v1012_v15 = vsel %vm1007_vm7, %v959_v14, 0.0  ;;  %v978_v17 = vsel %vm941_vm8, %v959_v14, 0.0  ;;  %v540_v33 = vrot.slane %v539_v8, 2  ;;  %v548_v14 = vadd.f32 %v547_v60, %v546_v48 }
 0x1dd   : > { %v1028_v18 = vsel %vm982_vm9, %v1012_v15, 0.0  ;;  %v2567_v20 = vsel %vm982_vm9, %v978_v17, 0.0 }
 0x1de   : > { %1029 = vadd.xlane.f32.xlu1 %v1028_v18  ;;  %v541_v17 = vadd.f32 %v540_v33, %v539_v8  ;;  %v549_v18 = vrot.slane %v548_v14, 2 }
 0x1e3   : > { %v961_v31 = vpop.permute.xlu2 %960 }
 0x1e4   : > { %v979_v22 = vsel %vm941_vm8, %v961_v31, 0.0  ;;  %v1013_v50 = vsel %vm1007_vm7, %v961_v31, 0.0  ;;  %v542_v31 = vrot.slane %v541_v17, 1 }
 0x1e5   : > { %v2572_v24 = vsel %vm982_vm9, %v979_v22, 0.0  ;;  %v1031_v54 = vsel %vm982_vm9, %v1013_v50, 0.0  ;;  %v550_v22 = vadd.f32 %v549_v18, %v548_v14 }
 0x1ec   : > { %v1156_v16 = vpop.permute.xlu2 %1155 }
 0x1f3   : > { %v951_v25 = vpop.permute.xlu0 %950 }
 0x1f4   : > { %v1008_v41 = vsel %vm1007_vm7, %v951_v25, 0.0  ;;  %v974_v49 = vsel %vm941_vm8, %v951_v25, 0.0 }
 0x1f5   : > { %v1016_v5 = vsel %vm982_vm9, %v1008_v41, 0.0  ;;  %v2580_v27 = vsel %vm982_vm9, %v974_v49, 0.0  ;;  %v543_v49 = vadd.f32 %v542_v31, %v541_v17 }
 0x1f6   : > { %1017 = vadd.xlane.f32.xlu2 %v1016_v5  ;;  %v551_v5 = vrot.slane %v550_v22, 1 }
 0x1fb   : > { %v953_v21 = vpop.permute.xlu0 %952 }
 0x1fc   : > { %v1009_v58 = vsel %vm1007_vm7, %v953_v21, 0.0  ;;  %v975_v28 = vsel %vm941_vm8, %v953_v21, 0.0 }
 0x1fd   : > { %v1019_v30 = vsel %vm982_vm9, %v1009_v58, 0.0  ;;  %v2588_v32 = vsel %vm982_vm9, %v975_v28, 0.0 }
 0x1fe   : > { %1020 = vadd.xlane.f32.xlu0 %v1019_v30  ;;  %v2648_v30 = vmul.f32 0.125, %v543_v49 }
 0x203   : > { %v955_v34 = vpop.permute.xlu1 %954  ;;  %v2598_v39 = vpop.permute.xlu0 %962 }
 0x204   : > { %v1010_v35 = vsel %vm1007_vm7, %v955_v34, 0.0  ;;  %v976_v36 = vsel %vm941_vm8, %v955_v34, 0.0  ;;  %v1014_v40 = vsel %vm1007_vm7, %v2598_v39, 0.0  ;;  %v552_v34 = vadd.f32 %v551_v5, %v550_v22 }
 0x205   : > { %v1022_v29 = vsel %vm982_vm9, %v1010_v35, 0.0  ;;  %v2596_v38 = vsel %vm982_vm9, %v976_v36, 0.0  ;;  %v1034_v45 = vsel %vm982_vm9, %v1014_v40, 0.0 }
 0x206   : > { %1023 = vadd.xlane.f32.xlu1 %v1022_v29 }
 0x20b   : > { %v957_v42 = vpop.permute.xlu1 %956 }
 0x20c   : > { %v1011_v43 = vsel %vm1007_vm7, %v957_v42, 0.0  ;;  %v977_v44 = vsel %vm941_vm8, %v957_v42, 0.0 }
 0x20d   : > { %v1025_v46 = vsel %vm982_vm9, %v1011_v43, 0.0  ;;  %v2610_v47 = vsel %vm982_vm9, %v977_v44, 0.0  ;;  %v553_v43 = vmul.f32 0.125, %v552_v34  ;;  %v554_v44 = vmul.f32 %v2648_v30, %v2648_v30 }
 0x20e   : > { %1035 = vadd.xlane.f32.xlu1 %v1034_v45  ;;  %1026 = vadd.xlane.f32.xlu0 %v1025_v46 }
 0x20f   : > { %v555_v2 = vsub.f32 %v553_v43, %v554_v44 }
 0x213   : > { %v965_v51 = vpop.permute.xlu1 %964 }
 0x214   : > { %v1015_v52 = vsel %vm1007_vm7, %v965_v51, 0.0  ;;  %v981_v53 = vsel %vm941_vm8, %v965_v51, 0.0 }
 0x215   : > { %v1037_v55 = vsel %vm982_vm9, %v1015_v52, 0.0  ;;  %v2621_v56 = vsel %vm982_vm9, %v981_v53, 0.0 }
 0x216   : > { %1032 = vadd.xlane.f32.xlu0 %v1031_v54  ;;  %1038 = vadd.xlane.f32.xlu2 %v1037_v55 }
 0x21e   : > { %1042 = vadd.xlane.f32.xlu0 %v1041_v61 }
 0x22e   : > { %1097 = vperm.xlu2 %2015, %v2028_v57  }
 0x251   : > { %v1030_v15 = vpop.xlane.xlu1 %1029 }
 0x252   : > { %v2666_v52 = vadd.f32 %v1156_v16, %v1030_v15 }
 0x254   : > { %v1203_v48 = vmul.f32 %v2666_v52, %v2666_v52  ;;  %v1178_v31 = vperm.slane %v2666_v52, %v2294_v23 }
 0x256   : > { %v1219_v34 = vperm.slane %v1203_v48, %v2294_v23  ;;  %v2723_v48 = vshrl.u32 %v655_v19, 7 }
 0x258   : > { %2018 = vset.pattern.permute.xlu2 %v2723_v48  ;;  %2016 = vset.pattern.permute.xlu1 %v2723_v48 }
 0x259   : > { %2017 = vset.pattern.permute.xlu0 %v2723_v48 }
 0x269   : > { %v1018_v21 = vpop.xlane.xlu2 %1017 }
 0x26a   : > { %v2650_v35 = vadd.f32 %v1156_v16, %v1018_v21 }
 0x26c   : > { %v1199_v45 = vmul.f32 %v2650_v35, %v2650_v35  ;;  %v1174_v54 = vperm.slane %v2650_v35, %v2294_v23 }
 0x26e   : > { %v1215_v6 = vperm.slane %v1199_v45, %v2294_v23 }
 0x271   : > { %v1021_v25 = vpop.xlane.xlu0 %1020 }
 0x272   : > { %v2644_v58 = vadd.f32 %v1156_v16, %v1021_v25 }
 0x274   : > { %v1200_v29 = vmul.f32 %v2644_v58, %v2644_v58  ;;  %v1175_v46 = vperm.slane %v2644_v58, %v2294_v23 }
 0x276   : > { %v1216_v55 = vperm.slane %v1200_v29, %v2294_v23  ;;  %v1182_v37 = vsel %vm1077_vm12, %v1175_v46, %v1174_v54 }
 0x278   : > { %v1223_v14 = vsel %vm1077_vm12, %v1216_v55, %v1215_v6 }
 0x279   : > { %v1024_v41 = vpop.xlane.xlu1 %1023 }
 0x27a   : > { %v2646_v28 = vadd.f32 %v1156_v16, %v1024_v41  ;;  %v556_v41 = vmax.f32 %v555_v2, 0.0 }
 0x27c   : > { %v1201_v42 = vmul.f32 %v2646_v28, %v2646_v28  ;;  %v1176_v53 = vperm.slane %v2646_v28, %v2294_v23 }
 0x27e   : > { %v1217_v61 = vperm.slane %v1201_v42, %v2294_v23  ;;  %v1183_v8 = vsel %vm1079_vm13, %v1176_v53, %v1182_v37 }
 0x280   : > { %v1224_v22 = vsel %vm1079_vm13, %v1217_v61, %v1223_v14 }
 0x281   : > { %v1027_v36 = vpop.xlane.xlu0 %1026  ;;  %v1036_v51 = vpop.xlane.xlu1 %1035 }
 0x282   : > { %v2654_v40 = vadd.f32 %v1156_v16, %v1027_v36  ;;  %v2676_v63 = vadd.f32 %v1156_v16, %v1036_v51  ;;  %v558_v51 = vadd.f32 1e-05, %v556_v41 }
 0x284   : > { %v1202_v50 = vmul.f32 %v2654_v40, %v2654_v40  ;;  %v1177_v57 = vperm.slane %v2654_v40, %v2294_v23  ;;  %v1205_v25 = vmul.f32 %v2676_v63, %v2676_v63  ;;  %v1180_v36 = vperm.slane %v2676_v63, %v2294_v23 }
 0x285   : > { %2034 = vrsqrt.f32 %v558_v51  ;;  %vm565_vm6 = vweird.f32 %v558_v51 }
 0x286   : > { %v1218_v7 = vperm.slane %v1202_v50, %v2294_v23  ;;  %v1184_v15 = vsel %vm1081_vm14, %v1177_v57, %v1183_v8  ;;  %v1221_v45 = vperm.slane %v1205_v25, %v2294_v23  ;;  %v2029_v25 = vld [vmem:[%s2984_s10] ss:$0 sm:$0xff] }
 0x287   : > { %v1185_v29 = vsel %vm1083_vm15, %v1178_v31, %v1184_v15 }
 0x289   : > { %v1033_v60 = vpop.xlane.xlu0 %1032  ;;  %v1039_v33 = vpop.xlane.xlu2 %1038 }
 0x28a   : > { %v2686_v17 = vadd.f32 %v1156_v16, %v1033_v60  ;;  %v2688_v18 = vadd.f32 %v1156_v16, %v1039_v33  ;;  %v1225_v16 = vsel %vm1081_vm14, %v1218_v7, %v1224_v22 }
 0x28b   : > { %v1226_v50 = vsel %vm1083_vm15, %v1219_v34, %v1225_v16  ;;  %v2035_v37 = vpop.eup %2034 }
 0x28c   : > { %v1179_v49 = vperm.slane %v2686_v17, %v2294_v23  ;;  %v1204_v5 = vmul.f32 %v2686_v17, %v2686_v17  ;;  %v1206_v21 = vmul.f32 %v2688_v18, %v2688_v18  ;;  %v1181_v43 = vperm.slane %v2688_v18, %v2294_v23 }
 0x28d   : > { %v560_v7 = vmul.f32 %v2035_v37, %v558_v51  ;;  %vm566_vm4 = vweird.f32 %v2035_v37 }
 0x28e   : > { %v1220_v42 = vperm.slane %v1204_v5, %v2294_v23  ;;  %v1186_v44 = vsel %vm1085_vm0, %v1179_v49, %v1185_v29  ;;  %v1222_v54 = vperm.slane %v1206_v21, %v2294_v23  ;;  %vm567_vm3 = vmor %vm565_vm6, %vm566_vm4 }
 0x28f   : > { %v1187_v46 = vsel %vm1087_vm1, %v1180_v36, %v1186_v44  ;;  %v561_v8 = vmul.f32 %v2035_v37, %v560_v7 }
 0x290   : > { %v1188_v53 = vsel %vm1089_vm2, %v1181_v43, %v1187_v46  ;;  %v1227_v55 = vsel %vm1085_vm0, %v1220_v42, %v1226_v50 }
 0x291   : > { %v1190_v57 = vsel %vm1040_vm10, %v1188_v53, 0.0  ;;  %v1228_v61 = vsel %vm1087_vm1, %v1221_v45, %v1227_v55  ;;  %v562_v60 = vmul.f32 0.5, %v561_v8 }
 0x292   : > { %1191 = vadd.xlane.f32.xlu0 %v1190_v57  ;;  %v1229_v2 = vsel %vm1089_vm2, %v1222_v54, %v1228_v61 }
 0x293   : > { %v1231_v6 = vsel %vm1040_vm10, %v1229_v2, 0.0  ;;  %v563_v33 = vsub.f32 1.5, %v562_v60 }
 0x294   : > { %1232 = vadd.xlane.f32.xlu1 %v1231_v6 }
 0x295   : > { %v564_v19 = vmul.f32 %v2035_v37, %v563_v33 }
 0x29a   : > { %987 = vadd.xlane.f32.xlu0 %v2588_v32  ;;  %v2139_v32 = vmov 0.0  }
 0x29c   : > { %984 = vadd.xlane.f32.xlu1 %v2580_v27  ;;  %v1043_v27 = vpop.xlane.xlu0 %1042 }
 0x29d   : > { %vm1044_vm5 = vcmp.gt.f32.partialorder %v1043_v27, 0.0 }
 0x29e   : > { %v2733_v14 = vsel %vm1044_vm5, 1.0, %v2139_v32 }
 0x29f   : > { %vm1047_vm7 = vcmp.gt.f32.partialorder %v2733_v14, 0.0 }
 0x2a2   : > { %993 = vadd.xlane.f32.xlu0 %v2610_v47  ;;  %v568_v47 = vsel %vm567_vm3, %v2035_v37, %v564_v19 }
 0x2a4   : > { %990 = vadd.xlane.f32.xlu1 %v2596_v38  ;;  %v1050_v38 = vsel %vm1047_vm7, %v2629_v59, 1.0 }
 0x2a5   : > { %v1051_v15 = vadd.f32 1e-08, %v1050_v38 }
 0x2a7   : > { %2036 = vrcp.f32 %v1051_v15 }
 0x2aa   : > { %999 = vadd.xlane.f32.xlu0 %v2572_v24  ;;  %v980_v24 = vsel %vm941_vm8, %v2598_v39, 0.0 }
 0x2ab   : > { %v1001_v31 = vsel %vm982_vm9, %v980_v24, 0.0 }
 0x2ac   : > { %996 = vadd.xlane.f32.xlu1 %v2567_v20  ;;  %v557_v20 = vsub.f32 %v2637_v3, %v2648_v30 }
 0x2ad   : > { %v2747_v41 = vpop.eup %2036 }
 0x2ae   : > { %v569_v22 = vmul.f32 %v568_v47, %v557_v20  ;;  %v1355_v39 = vperm.slane %v2747_v41, 2  ;;  %v1369_v3 = vperm.slane %v2747_v41, 4  ;;  %v1376_v30 = vperm.slane %v2747_v41, 5 }
 0x2af   : > { %v1383_v5 = vperm.slane %v2747_v41, 6  ;;  %v1341_v21 = vperm.slane %v2747_v41, 0  ;;  %v1390_v16 = vperm.slane %v2747_v41, 7 }
 0x2b0   : > { %v1057_v59 = vmul.f32 %v2029_v25, %v569_v22  ;;  %1360 = vperm.xlu2 %2018, %v1355_v39  }
 0x2b2   : > { %1005 = vadd.xlane.f32.xlu0 %v2621_v56  ;;  %v1058_v49 = vsel %vm536_vm11, %v1057_v59, 0.0  ;;  %v1362_v56 = vperm.slane %v2747_v41, 3 }
 0x2b4   : > { %1002 = vadd.xlane.f32.xlu1 %v1001_v31 }
 0x2b8   : > { %1367 = vperm.xlu2 %2018, %v1362_v56  }
 0x2bc   : > { %1059 = vadd.xlane.f32.xlu1 %v1058_v49 }
 0x2c0   : > { %1374 = vperm.xlu2 %2018, %v1369_v3  }
 0x2c8   : > { %1381 = vperm.xlu2 %2018, %v1376_v30  }
 0x2d0   : > { %1388 = vperm.xlu2 %2018, %v1383_v5  }
 0x2d5   : > { %1346 = vperm.xlu1 %2016, %v1341_v21  }
 0x2d8   : > { %1395 = vperm.xlu2 %2018, %v1390_v16  }
 0x2dd   : > { %2020 = vset.pattern.permute.xlu1 %v2138_v62 }
 0x2e0   : > { %2019 = vset.pattern.permute.xlu2 %v2138_v62 }
 0x305   : > { %v1192_v34 = vpop.xlane.xlu0 %1191 }
 0x306   : > { %v1193_v36 = vrot.slane %v1192_v34, 4 }
 0x307   : > { %v1233_v29 = vpop.xlane.xlu1 %1232 }
 0x308   : > { %v1194_v42 = vadd.f32 %v1193_v36, %v1192_v34  ;;  %v1234_v43 = vrot.slane %v1233_v29, 4 }
 0x30a   : > { %v1195_v44 = vrot.slane %v1194_v42, 2  ;;  %v1235_v45 = vadd.f32 %v1234_v43, %v1233_v29 }
 0x30c   : > { %v1196_v46 = vadd.f32 %v1195_v44, %v1194_v42  ;;  %v1236_v50 = vrot.slane %v1235_v45, 2 }
 0x30d   : > { %v988_v51 = vpop.xlane.xlu0 %987 }
 0x30e   : > { %v1197_v53 = vrot.slane %v1196_v46, 1  ;;  %v1237_v54 = vadd.f32 %v1236_v50, %v1235_v45  ;;  %v1070_v20 = vperm.slane %v988_v51, %v2294_v23 }
 0x30f   : > { %v985_v55 = vpop.xlane.xlu1 %984 }
 0x310   : > { %v1198_v57 = vadd.f32 %v1197_v53, %v1196_v46  ;;  %v1238_v61 = vrot.slane %v1237_v54, 1  ;;  %v1069_v38 = vperm.slane %v985_v55, %v2294_v23 }
 0x312   : > { %v1240_v2 = vmul.f32 0.015625, %v1198_v57  ;;  %v1239_v6 = vadd.f32 %v1238_v61, %v1237_v54  ;;  %v1078_v25 = vsel %vm1077_vm12, %v1070_v20, %v1069_v38 }
 0x314   : > { %v1241_v37 = vmul.f32 0.015625, %v1239_v6  ;;  %v1242_v7 = vmul.f32 %v1240_v2, %v1240_v2  ;;  %v1245_v42 = vsub.f32 %v2650_v35, %v1240_v2  ;;  %v1246_v45 = vsub.f32 %v2644_v58, %v1240_v2 }
 0x315   : > { %v994_v60 = vpop.xlane.xlu0 %993  ;;  %v1247_v50 = vsub.f32 %v2646_v28, %v1240_v2  ;;  %v1248_v51 = vsub.f32 %v2654_v40, %v1240_v2  ;;  %v1249_v53 = vsub.f32 %v2666_v52, %v1240_v2  ;;  %v1250_v35 = vsub.f32 %v2686_v17, %v1240_v2 }
 0x316   : > { %v1243_v8 = vsub.f32 %v1241_v37, %v1242_v7  ;;  %v1072_v56 = vperm.slane %v994_v60, %v2294_v23  ;;  %v1251_v57 = vsub.f32 %v2676_v63, %v1240_v2  ;;  %v1252_v28 = vsub.f32 %v2688_v18, %v1240_v2 }
 0x317   : > { %v991_v33 = vpop.xlane.xlu1 %990 }
 0x318   : > { %v1244_v27 = vmax.f32 %v1243_v8, 0.0  ;;  %v1071_v47 = vperm.slane %v991_v33, %v2294_v23 }
 0x31a   : > { %v1253_v19 = vadd.f32 1e-05, %v1244_v27  ;;  %v1080_v59 = vsel %vm1079_vm13, %v1071_v47, %v1078_v25  ;;  %v1098_v27 = vpop.permute.xlu2 %1097 }
 0x31b   : > { %v1082_v30 = vsel %vm1081_vm14, %v1072_v56, %v1080_v59 }
 0x31c   : > { %2038 = vrsqrt.f32 %v1253_v19  ;;  %vm1260_vm8 = vweird.f32 %v1253_v19 }
 0x31d   : > { %v1000_v15 = vpop.xlane.xlu0 %999 }
 0x31e   : > { %v1074_v36 = vperm.slane %v1000_v15, %v2294_v23 }
 0x31f   : > { %v997_v24 = vpop.xlane.xlu1 %996 }
 0x320   : > { %v1073_v39 = vperm.slane %v997_v24, %v2294_v23 }
 0x322   : > { %v2039_v31 = vpop.eup %2038  ;;  %v1084_v21 = vsel %vm1083_vm15, %v1073_v39, %v1082_v30 }
 0x323   : > { %v1255_v22 = vmul.f32 %v2039_v31, %v1253_v19  ;;  %vm1261_vm3 = vweird.f32 %v2039_v31  ;;  %v1086_v44 = vsel %vm1085_vm0, %v1074_v36, %v1084_v21 }
 0x324   : > { %vm1262_vm9 = vmor %vm1260_vm8, %vm1261_vm3 }
 0x325   : > { %v1256_v49 = vmul.f32 %v2039_v31, %v1255_v22  ;;  %v1006_v29 = vpop.xlane.xlu0 %1005 }
 0x326   : > { %v1076_v55 = vperm.slane %v1006_v29, %v2294_v23 }
 0x327   : > { %v1257_v3 = vmul.f32 0.5, %v1256_v49  ;;  %v1003_v5 = vpop.xlane.xlu1 %1002 }
 0x328   : > { %v1075_v16 = vperm.slane %v1003_v5, %v2294_v23  ;;  %v1348_v5 = vperm.slane %v2747_v41, 1 }
 0x329   : > { %v1258_v34 = vsub.f32 1.5, %v1257_v3 }
 0x32a   : > { %v1088_v46 = vsel %vm1087_vm1, %v1075_v16, %v1086_v44 }
 0x32b   : > { %v1259_v43 = vmul.f32 %v2039_v31, %v1258_v34  ;;  %v1090_v8 = vsel %vm1089_vm2, %v1076_v55, %v1088_v46  ;;  %v1361_v34 = vpop.permute.xlu2 %1360 }
 0x32d   : > { %v1263_v54 = vsel %vm1262_vm9, %v2039_v31, %v1259_v43 }
 0x32e   : > { %v1264_v61 = vmul.f32 %v1263_v54, %v1245_v42  ;;  %v1265_v6 = vmul.f32 %v1263_v54, %v1246_v45  ;;  %v1266_v37 = vmul.f32 %v1263_v54, %v1247_v50  ;;  %v2780_v58 = vmul.f32 %v1263_v54, %v1248_v51 }
 0x32f   : > { %v1060_v7 = vpop.xlane.xlu1 %1059  ;;  %v2784_v40 = vmul.f32 %v1263_v54, %v1249_v53  ;;  %v1269_v52 = vmul.f32 %v1263_v54, %v1250_v35  ;;  %v1270_v19 = vmul.f32 %v1263_v54, %v1251_v57  ;;  %v2791_v24 = vmul.f32 %v1263_v54, %v1252_v28 }
 0x330   : > { %v1092_v60 = vsub.f32 %v1060_v7, %v1090_v8  ;;  %v1280_v33 = vperm.slane %v1264_v61, %v2294_v23  ;;  %v1281_v17 = vperm.slane %v1265_v6, %v2294_v23  ;;  %v1282_v63 = vperm.slane %v1266_v37, %v2294_v23 }
 0x331   : > { %v1283_v47 = vperm.slane %v2780_v58, %v2294_v23  ;;  %v1284_v2 = vperm.slane %v2784_v40, %v2294_v23  ;;  %v1285_v31 = vperm.slane %v1269_v52, %v2294_v23  ;;  %v1286_v25 = vperm.slane %v1270_v19, %v2294_v23 }
 0x332   : > { %v2789_v38 = vadd.f32 %v1098_v27, %v1092_v60  ;;  %v1288_v18 = vsel %vm1077_vm12, %v1281_v17, %v1280_v33  ;;  %v1287_v39 = vperm.slane %v2791_v24, %v2294_v23 }
 0x333   : > { %v1289_v15 = vsel %vm1079_vm13, %v1282_v63, %v1288_v18  ;;  %v1368_v36 = vpop.permute.xlu2 %1367 }
 0x334   : > { %v1101_v20 = vsel %vm1040_vm10, %v2789_v38, 0.0  ;;  %v1290_v22 = vsel %vm1081_vm14, %v1283_v47, %v1289_v15  ;;  %v1110_v21 = vmul.f32 %v2789_v38, %v2789_v38 }
 0x335   : > { %1102 = vadd.xlane.f32.xlu1 %v1101_v20  ;;  %v1291_v59 = vsel %vm1083_vm15, %v1284_v2, %v1290_v22 }
 0x336   : > { %v1292_v49 = vsel %vm1085_vm0, %v1285_v31, %v1291_v59  ;;  %v1111_v16 = vsel %vm1040_vm10, %v1110_v21, 0.0 }
 0x337   : > { %v1293_v56 = vsel %vm1087_vm1, %v1286_v25, %v1292_v49 }
 0x338   : > { %v1294_v3 = vsel %vm1089_vm2, %v1287_v39, %v1293_v56 }
 0x339   : > { %v1296_v30 = vsel %vm1040_vm10, %v1294_v3, -inf }
 0x33a   : > { %1297 = vmax.xlane.f32.xlu0 %v1296_v30 }
 0x33b   : > { %v1375_v46 = vpop.permute.xlu2 %1374 }
 0x343   : > { %v1382_v33 = vpop.permute.xlu2 %1381 }
 0x347   : > { %v1347_v63 = vpop.permute.xlu1 %1346 }
 0x34b   : > { %v1389_v59 = vpop.permute.xlu2 %1388 }
 0x34e   : > { %1353 = vperm.xlu0 %2017, %v1348_v5  }
 0x356   : > { %2021 = vset.pattern.permute.xlu0 %v2138_v62 }
 0x378   : > { %1112 = vadd.xlane.f32.xlu0 %v1111_v16 }
 0x3a8   : > { %v1103_v16 = vpop.xlane.xlu1 %1102 }
 0x3ad   : > { %v1298_v29 = vpop.xlane.xlu0 %1297 }
 0x3ae   : > { %v1305_v42 = vperm.slane %v1298_v29, 5  ;;  %v1300_v43 = vperm.slane %v1298_v29, 0  ;;  %v1301_v44 = vperm.slane %v1298_v29, 1  ;;  %v1302_v45 = vperm.slane %v1298_v29, 2 }
 0x3af   : > { %v1306_v35 = vperm.slane %v1298_v29, 6  ;;  %v1303_v8 = vperm.slane %v1298_v29, 3  ;;  %v1304_v47 = vperm.slane %v1298_v29, 4  ;;  %v1307_v25 = vperm.slane %v1298_v29, 7 }
 0x3b0   : > { %v1321_v50 = vsub.f32 %v1269_v52, %v1305_v42  ;;  %v1316_v51 = vsub.f32 %v1264_v61, %v1300_v43  ;;  %v1317_v55 = vsub.f32 %v1265_v6, %v1301_v44  ;;  %v1318_v62 = vsub.f32 %v1266_v37, %v1302_v45 }
 0x3b1   : > { %v1322_v28 = vsub.f32 %v1270_v19, %v1306_v35  ;;  %v1319_v61 = vsub.f32 %v2780_v58, %v1303_v8  ;;  %v1320_v58 = vsub.f32 %v2784_v40, %v1304_v47  ;;  %v1323_v56 = vsub.f32 %v2791_v24, %v1307_v25 }
 0x3b2   : > { %v1334_v53 = vmul.f32 1.442695, %v1321_v50  ;;  %v1324_v54 = vmul.f32 1.442695, %v1316_v51  ;;  %v1326_v57 = vmul.f32 1.442695, %v1317_v55 }
 0x3b3   : > { %v1328_v7 = vmul.f32 1.442695, %v1318_v62  ;;  %v1336_v6 = vmul.f32 1.442695, %v1322_v28  ;;  %v1330_v37 = vmul.f32 1.442695, %v1319_v61 }
 0x3b4   : > { %2040 = vpow2.f32 %v1334_v53  ;;  %v1332_v22 = vmul.f32 1.442695, %v1320_v58  ;;  %v1338_v40 = vmul.f32 1.442695, %v1323_v56  ;;  %v1104_v29 = vrot.slane %v1103_v16, 4 }
 0x3b5   : > { %2042 = vpow2.f32 %v1324_v54 }
 0x3b6   : > { %2044 = vpow2.f32 %v1326_v57  ;;  %v1105_v24 = vadd.f32 %v1104_v29, %v1103_v16 }
 0x3b7   : > { %2046 = vpow2.f32 %v1328_v7 }
 0x3b8   : > { %2048 = vpow2.f32 %v1336_v6  ;;  %v1106_v43 = vrot.slane %v1105_v24, 2 }
 0x3b9   : > { %2050 = vpow2.f32 %v1330_v37 }
 0x3ba   : > { %v2041_v60 = vpop.eup %2040  ;;  %2052 = vpow2.f32 %v1332_v22  ;;  %v1107_v44 = vadd.f32 %v1106_v43, %v1105_v24 }
 0x3bb   : > { %v2043_v17 = vpop.eup %2042  ;;  %v2816_v27 = vmul.f32 %v2041_v60, %v1382_v33  ;;  %2054 = vpow2.f32 %v1338_v40 }
 0x3bc   : > { %v2819_v52 = vmul.f32 %v2043_v17, %v1347_v63  ;;  %v2045_v19 = vpop.eup %2044  ;;  %v1108_v50 = vrot.slane %v1107_v44, 1 }
 0x3bd   : > { %1437 = vperm.xlu0 %2021, %v2816_v27   ;;  %v2047_v2 = vpop.eup %2046 }
 0x3be   : > { %1422 = vperm.xlu2 %2019, %v2819_v52   ;;  %v2827_v20 = vmul.f32 %v2047_v2, %v1361_v34  ;;  %v2049_v31 = vpop.eup %2048  ;;  %v1396_v34 = vpop.permute.xlu2 %1395  ;;  %v1109_v55 = vadd.f32 %v1108_v50, %v1107_v44 }
 0x3bf   : > { %v2051_v39 = vpop.eup %2050  ;;  %v2830_v49 = vmul.f32 %v2049_v31, %v1389_v59 }
 0x3c0   : > { %v1354_v18 = vpop.permute.xlu0 %1353  ;;  %v2834_v3 = vmul.f32 %v2051_v39, %v1368_v36  ;;  %v2053_v30 = vpop.eup %2052  ;;  %v503_v36 = vld [vmem:[%s485_s27] sm:$0xff]  ;;  %v1120_v7 = vmul.f32 0.015625, %v1109_v55  ;;  %s1788_s27 = scalar_lea.sflag [#allocation5], %s474_s26 }
 0x3c1   : > { %v2823_v15 = vmul.f32 %v2045_v19, %v1354_v18  ;;  %v2837_v5 = vmul.f32 %v2053_v30, %v1375_v46  ;;  %v2055_v21 = vpop.eup %2054  ;;  %2056 = vrsqrt.f32 %v503_v36  ;;  %vm1547_vm4 = vcmp.eq.f32.partialorder %v503_v36, inf }
 0x3c2   : > { %v2840_v42 = vmul.f32 %v2055_v21, %v1396_v34  ;;  %v1122_v33 = vmul.f32 %v1120_v7, %v1120_v7  ;;  %v1550_v18 = vand.u32 2147483648, %v503_v36  ;;  %vm1549_vm5 = vcmp.eq.f32.partialorder %v503_v36, 0.0 }
 0x3c3   : > { %1425 = vperm.xlu1 %2020, %v2823_v15   ;;  %v1125_v30 = vsub.f32 %v2789_v38, %v1120_v7 }
 0x3c6   : > { %1428 = vperm.xlu2 %2019, %v2827_v20  }
 0x3c7   : > { %v2057_v45 = vpop.eup %2056 }
 0x3c8   : > { %v1541_v53 = vmul.f32 %v2057_v45, %v503_v36 }
 0x3ca   : > { %v1542_v35 = vmul.f32 %v2057_v45, %v1541_v53 }
 0x3cb   : > { %1440 = vperm.xlu1 %2020, %v2830_v49  }
 0x3cc   : > { %v1543_v28 = vmul.f32 0.5, %v1542_v35 }
 0x3ce   : > { %1431 = vperm.xlu2 %2019, %v2834_v3   ;;  %v1544_v63 = vsub.f32 1.5, %v1543_v28 }
 0x3d0   : > { %v1545_v37 = vmul.f32 %v2057_v45, %v1544_v63 }
 0x3d2   : > { %v1546_v19 = vmul.f32 %v1545_v37, %v503_v36 }
 0x3d4   : > { %v1548_v2 = vsel %vm1547_vm4, %v503_v36, %v1546_v19 }
 0x3d5   : > { %v1551_v22 = vsel %vm1549_vm5, %v1550_v18, %v1548_v2 }
 0x3d6   : > { %1434 = vperm.xlu2 %2019, %v2837_v5   ;;  %v1552_v39 = vadd.f32 1e-08, %v1551_v22 }
 0x3de   : > { %1443 = vperm.xlu2 %2019, %v2840_v42  }
 0x3eb   : > { %v1113_v46 = vpop.xlane.xlu0 %1112 }
 0x3ec   : > { %v1114_v51 = vrot.slane %v1113_v46, 4 }
 0x3ee   : > { %v1115_v54 = vadd.f32 %v1114_v51, %v1113_v46 }
 0x3f0   : > { %v1116_v62 = vrot.slane %v1115_v54, 2 }
 0x3f2   : > { %v1117_v57 = vadd.f32 %v1116_v62, %v1115_v54 }
 0x3f4   : > { %v1118_v8 = vrot.slane %v1117_v57, 1 }
 0x3f6   : > { %v1119_v60 = vadd.f32 %v1118_v8, %v1117_v57 }
 0x3f8   : > { %v1121_v17 = vmul.f32 0.015625, %v1119_v60 }
 0x3fa   : > { %v1123_v61 = vsub.f32 %v1121_v17, %v1122_v33 }
 0x3fc   : > { %v1124_v6 = vmax.f32 %v1123_v61, 0.0 }
 0x3fe   : > { %v1126_v47 = vadd.f32 1e-05, %v1124_v6 }
 0x400   : > { %2058 = vrsqrt.f32 %v1126_v47  ;;  %vm1133_vm7 = vweird.f32 %v1126_v47 }
 0x401   : > { %2060 = vrcp.f32 %v1552_v39 }
 0x406   : > { %v2059_v58 = vpop.eup %2058 }
 0x407   : > { %v1128_v31 = vmul.f32 %v2059_v58, %v1126_v47  ;;  %vm1134_vm6 = vweird.f32 %v2059_v58  ;;  %v2061_v29 = vpop.eup %2060 }
 0x408   : > { %vm1135_vm3 = vmor %vm1133_vm7, %vm1134_vm6  ;;  %v2851_v36 = vmul.f32 %v2061_v29, %v2747_v41 }
 0x409   : > { %v1129_v25 = vmul.f32 %v2059_v58, %v1128_v31 }
 0x40a   : > { %v1555_v43 = vsel %vm1040_vm10, %v2851_v36, 0.0 }
 0x40b   : > { %v1130_v59 = vmul.f32 0.5, %v1129_v25 }
 0x40d   : > { %v1131_v56 = vsub.f32 1.5, %v1130_v59 }
 0x40f   : > { %v1132_v40 = vmul.f32 %v2059_v58, %v1131_v56 }
 0x411   : > { %v1136_v21 = vsel %vm1135_vm3, %v2059_v58, %v1132_v40 }
 0x412   : > { %v1137_v16 = vmul.f32 %v1136_v21, %v1125_v30 }
 0x414   : > { %v1138_v34 = vsel %vm1040_vm10, %v1137_v16, -inf }
 0x415   : > { %1139 = vmax.xlane.f32.xlu1 %v1138_v34 }
 0x418   : > { %v1423_v24 = vpop.permute.xlu2 %1422 }
 0x419   : > { %v1445_v38 = vperm.slane %v1423_v24, %v2294_v23 }
 0x41d   : > { %1556 = vadd.xlane.f32.xlu1 %v1555_v43 }
 0x420   : > { %v1429_v44 = vpop.permute.xlu2 %1428 }
 0x421   : > { %v1447_v53 = vperm.slane %v1429_v44, %v2294_v23 }
 0x428   : > { %v1432_v45 = vpop.permute.xlu2 %1431 }
 0x429   : > { %v1448_v54 = vperm.slane %v1432_v45, %v2294_v23 }
 0x42f   : > { %v1438_v57 = vpop.permute.xlu0 %1437 }
 0x430   : > { %v1435_v46 = vpop.permute.xlu2 %1434  ;;  %v1450_v60 = vperm.slane %v1438_v57, %v2294_v23 }
 0x431   : > { %v1449_v35 = vperm.slane %v1435_v46, %v2294_v23 }
 0x435   : > { %v1426_v50 = vpop.permute.xlu1 %1425 }
 0x436   : > { %v1446_v51 = vperm.slane %v1426_v50, %v2294_v23 }
 0x438   : > { %v1453_v55 = vsel %vm1077_vm12, %v1446_v51, %v1445_v38  ;;  %v1444_v8 = vpop.permute.xlu2 %1443 }
 0x439   : > { %v1454_v62 = vsel %vm1079_vm13, %v1447_v53, %v1453_v55  ;;  %v1452_v63 = vperm.slane %v1444_v8, %v2294_v23 }
 0x43a   : > { %v1455_v7 = vsel %vm1081_vm14, %v1448_v54, %v1454_v62 }
 0x43b   : > { %v1456_v28 = vsel %vm1083_vm15, %v1449_v35, %v1455_v7 }
 0x43c   : > { %v1457_v61 = vsel %vm1085_vm0, %v1450_v60, %v1456_v28 }
 0x43d   : > { %v1441_v33 = vpop.permute.xlu1 %1440 }
 0x43e   : > { %v1451_v17 = vperm.slane %v1441_v33, %v2294_v23 }
 0x440   : > { %v1458_v6 = vsel %vm1087_vm1, %v1451_v17, %v1457_v61 }
 0x441   : > { %v1459_v37 = vsel %vm1089_vm2, %v1452_v63, %v1458_v6 }
 0x442   : > { %v1461_v47 = vsel %vm1040_vm10, %v1459_v37, 0.0 }
 0x443   : > { %1462 = vadd.xlane.f32.xlu2 %v1461_v47 }
 0x488   : > { %v1140_v19 = vpop.xlane.xlu1 %1139 }
 0x489   : > { %v1141_v18 = vsub.f32 %v1137_v16, %v1140_v19 }
 0x48b   : > { %v1142_v2 = vmul.f32 1.442695, %v1141_v18 }
 0x48d   : > { %2062 = vpow2.f32 %v1142_v2 }
 0x493   : > { %v2063_v58 = vpop.eup %2062 }
 0x494   : > { %v2872_v31 = vmul.f32 %v2063_v58, %v2747_v41 }
 0x496   : > { %v1145_v22 = vsel %vm1040_vm10, %v2872_v31, 0.0 }
 0x497   : > { %1146 = vadd.xlane.f32.xlu0 %v1145_v22 }
 0x4b6   : > { %v1463_v25 = vpop.xlane.xlu2 %1462 }
 0x4b7   : > { %v1464_v59 = vadd.f32 1e-08, %v1463_v25 }
 0x4b9   : > { %2064 = vrcp.f32 %v1464_v59 }
 0x4bf   : > { %v2065_v39 = vpop.eup %2064 }
 0x4c0   : > { %v1470_v56 = vperm.slane %v2065_v39, 3  ;;  %v1468_v40 = vperm.slane %v2065_v39, 1  ;;  %v1467_v30 = vperm.slane %v2065_v39, 0  ;;  %v1471_v41 = vperm.slane %v2065_v39, 4 }
 0x4c1   : > { %v1469_v29 = vperm.slane %v2065_v39, 2  ;;  %v1473_v44 = vperm.slane %v2065_v39, 6  ;;  %v1472_v45 = vperm.slane %v2065_v39, 5 }
 0x4c2   : > { %v1486_v21 = vmul.f32 %v1470_v56, %v2834_v3  ;;  %v1484_v16 = vmul.f32 %v1468_v40, %v2823_v15  ;;  %v1483_v34 = vmul.f32 %v1467_v30, %v2819_v52  ;;  %v1487_v24 = vmul.f32 %v1471_v41, %v2837_v5 }
 0x4c3   : > { %v1485_v43 = vmul.f32 %v1469_v29, %v2827_v20  ;;  %v1489_v3 = vmul.f32 %v1473_v44, %v2830_v49  ;;  %v1488_v15 = vmul.f32 %v1472_v45, %v2816_v27  ;;  %v1474_v52 = vperm.slane %v2065_v39, 7  ;;  %v1557_v20 = vpop.xlane.xlu1 %1556 }
 0x4c4   : > { %1509 = vperm.xlu0 %2021, %v1486_v21   ;;  %1503 = vperm.xlu1 %2020, %v1484_v16   ;;  %v1558_v27 = vadd.f32 1e-08, %v1557_v20 }
 0x4c5   : > { %1500 = vperm.xlu2 %2019, %v1483_v34   ;;  %v1490_v46 = vmul.f32 %v1474_v52, %v2840_v42 }
 0x4cc   : > { %1512 = vperm.xlu1 %2020, %v1487_v24   ;;  %2022 = vset.pattern.permute.xlu0 %v2723_v48 }
 0x4cd   : > { %1506 = vperm.xlu2 %2019, %v1485_v43  }
 0x4d4   : > { %1518 = vperm.xlu1 %2020, %v1489_v3  }
 0x4d5   : > { %1515 = vperm.xlu2 %2019, %v1488_v15  }
 0x4dd   : > { %1521 = vperm.xlu2 %2019, %v1490_v46  }
 0x4e5   : > { %2023 = vset.pattern.permute.xlu2 %v2723_v48 }
 0x50a   : > { %v1147_v51 = vpop.xlane.xlu0 %1146 }
 0x50b   : > { %v1148_v55 = vadd.f32 1e-08, %v1147_v51 }
 0x50d   : > { %2066 = vrcp.f32 %v1148_v55 }
 0x50e   : > { %2068 = vrcp.f32 %v1558_v27 }
 0x513   : > { %v2067_v17 = vpop.eup %2066 }
 0x514   : > { %v2069_v37 = vpop.eup %2068  ;;  %v1150_v2 = vmul.f32 %v2067_v17, %v2872_v31 }
 0x515   : > { %v1560_v25 = vmul.f32 %v2069_v37, %v2851_v36 }
 0x51f   : > { %v1501_v5 = vpop.permute.xlu2 %1500 }
 0x520   : > { %v1523_v49 = vperm.slane %v1501_v5, %v2294_v23 }
 0x527   : > { %v1507_v50 = vpop.permute.xlu2 %1506 }
 0x528   : > { %v1525_v42 = vperm.slane %v1507_v50, %v2294_v23 }
 0x52f   : > { %v1516_v54 = vpop.permute.xlu2 %1515 }
 0x530   : > { %v1528_v63 = vperm.slane %v1516_v54, %v2294_v23 }
 0x536   : > { %v1504_v38 = vpop.permute.xlu1 %1503  ;;  %v1510_v57 = vpop.permute.xlu0 %1509 }
 0x537   : > { %v1524_v53 = vperm.slane %v1504_v38, %v2294_v23  ;;  %v1526_v8 = vperm.slane %v1510_v57, %v2294_v23  ;;  %v1522_v60 = vpop.permute.xlu2 %1521 }
 0x538   : > { %v1530_v47 = vperm.slane %v1522_v60, %v2294_v23 }
 0x539   : > { %v1531_v62 = vsel %vm1077_vm12, %v1524_v53, %v1523_v49 }
 0x53a   : > { %v1532_v48 = vsel %vm1079_vm13, %v1525_v42, %v1531_v62 }
 0x53b   : > { %v1533_v28 = vsel %vm1081_vm14, %v1526_v8, %v1532_v48 }
 0x53e   : > { %v1513_v35 = vpop.permute.xlu1 %1512 }
 0x53f   : > { %v1527_v7 = vperm.slane %v1513_v35, %v2294_v23 }
 0x541   : > { %v1534_v33 = vsel %vm1083_vm15, %v1527_v7, %v1533_v28 }
 0x542   : > { %v1535_v19 = vsel %vm1085_vm0, %v1528_v63, %v1534_v33 }
 0x546   : > { %v1519_v61 = vpop.permute.xlu1 %1518 }
 0x547   : > { %v1529_v6 = vperm.slane %v1519_v61, %v2294_v23 }
 0x549   : > { %v1536_v18 = vsel %vm1087_vm1, %v1529_v6, %v1535_v19 }
 0x54a   : > { %v1537_v58 = vsel %vm1089_vm2, %v1530_v47, %v1536_v18 }
 0x54b   : > { %v1539_v22 = vmul.f32 %v1537_v58, %v1150_v2 }
 0x54d   : > { %v1561_v59 = vmul.f32 %v1560_v25, %v1539_v22 }
 0x54f   : > { %v1562_v39 = vsel %vm1040_vm10, %v1561_v59, 0.0  ;;  %vm2995_vm10 = vcmask 523264  }
 0x550   : > { %1563 = vadd.xlane.f32.xlu1 %v1562_v39  ;;  %vm2996_vm8 = vmmov %vm2995_vm10 }
 0x551   : > { %vm2997_vm9 = vmmov %vm2996_vm8 }
 0x552   : > { %vm2998_vm4 = vmmov %vm2996_vm8 }
 0x553   : > { %vm2999_vm5 = vmmov %vm2998_vm4 }
 0x554   : > { %vm3000_vm6 = vmmov %vm2998_vm4 }
 0x5c3   : > { %v1564_v56 = vpop.xlane.xlu1 %1563 }
 0x5c4   : > { %v1565_v40 = vadd.f32 1e-08, %v1564_v56 }
 0x5c6   : > { %2070 = vrcp.f32 %v1565_v40 }
 0x5cc   : > { %v2071_v30 = vpop.eup %2070 }
 0x5cd   : > { %v1567_v23 = vmul.f32 %v2071_v30, %v1561_v59 }
 0x5cf   : > { %v1568_v21 = vmul.f32 %v2733_v14, %v1567_v23 }
 0x5d1   : > { %v1576_v16 = vperm.slane %v1568_v21, 1  ;;  %v1569_v34 = vperm.slane %v1568_v21, 0  ;;  %v1583_v31 = vperm.slane %v1568_v21, 2  ;;  %v1590_v41 = vperm.slane %v1568_v21, 3 }
 0x5d2   : > { %v1597_v36 = vperm.slane %v1568_v21, 4  ;;  %v1604_v29 = vperm.slane %v1568_v21, 5  ;;  %v1611_v24 = vperm.slane %v1568_v21, 6  ;;  %v1618_v43 = vperm.slane %v1568_v21, 7 }
 0x5d3   : > { %1581 = vperm.xlu2 %2023, %v1576_v16   ;;  %1574 = vperm.xlu0 %2022, %v1569_v34  }
 0x5db   : > { %1588 = vperm.xlu2 %2023, %v1583_v31   ;;  %1595 = vperm.xlu0 %2022, %v1590_v41  }
 0x5e3   : > { %1602 = vperm.xlu2 %2023, %v1597_v36   ;;  %1609 = vperm.xlu0 %2022, %v1604_v29  }
 0x5eb   : > { %1616 = vperm.xlu2 %2023, %v1611_v24   ;;  %1623 = vperm.xlu0 %2022, %v1618_v43  }
 0x5f3   : > { %1761 = vrot.lane.b32.xlu2 %v2461_v26, %s2137_s24  ;;  %s1902_s24 = sshll.u32 %s474_s26, 3 }
 0x5f4   : > { %s2920_s25 = scalar_lea.vmem [#allocation4], %s1902_s24  ;;  %s2086_s24 = sshra.s32 %s1803_s4, 4  ;;  %s2087_s24 = int_to_ptr.hbm [resolvable:$true] %s2086_s24 }
 0x5f5   : > { %s1800_s23 = sshll.u32 %s2920_s25, 4  ;;  %s2088_s11 = scalar_lea.hbm %s2087_s24, 8  ;;  %s1801_s23 = int_to_ptr.vmem [resolvable:$true] %s1800_s23 }
 0x5f6   : > { %p2089_p11 = scmp.ne.s32.totalorder %s2087_s24, %s2088_s11  ;;  %p2093_p0 = scmp.lt.s32.totalorder %s2087_s24, %s2986_s13 }
 0x5f7   : > { %p2094_p1 = scmp.lt.s32.totalorder %s2092_s17, %s2088_s11 }
 0x5f8   : > { %p2090_p12 = pnand %p2089_p11, %p2255_p5 }
 0x5f9   : > { %p2095_p2 = por %p2094_p1, %p2093_p0 }
 0x5fa   : > { %p2091_p13 = pneg %p2090_p12 }
 0x5fc   : > { %p2096_p3 = pnand %p2095_p2, %p2091_p13 }
 0x62d   : > { %v1582_v14 = vpop.permute.xlu2 %1581 }
 0x62e   : > { %v1626_v45 = vmul.f32 %v1582_v14, %v2543_v4 }
 0x630   : > { %v1640_v15 = vsel %vm2995_vm10, %v1626_v45, 0.0 }
 0x631   : > { %v1641_v5 = vrot.slane %v1640_v15, 4 }
 0x633   : > { %v1642_v38 = vadd.f32 %v1641_v5, %v1640_v15 }
 0x635   : > { %v1589_v44 = vpop.permute.xlu2 %1588 }
 0x636   : > { %v1627_v3 = vmul.f32 %v1589_v44, %v2545_v1  ;;  %v1643_v1 = vrot.slane %v1642_v38, 2 }
 0x638   : > { %v1647_v52 = vsel %vm2996_vm8, %v1627_v3, 0.0 }
 0x639   : > { %v1648_v20 = vrot.slane %v1647_v52, 4 }
 0x63b   : > { %v1649_v51 = vadd.f32 %v1648_v20, %v1647_v52 }
 0x63d   : > { %v1603_v46 = vpop.permute.xlu2 %1602  ;;  %v1650_v55 = vrot.slane %v1649_v51, 2 }
 0x63e   : > { %v1629_v50 = vmul.f32 %v1603_v46, %v2547_v0  ;;  %v1644_v0 = vadd.f32 %v1643_v1, %v1642_v38 }
 0x63f   : > { %v1651_v57 = vadd.f32 %v1650_v55, %v1649_v51 }
 0x640   : > { %v1661_v26 = vsel %vm2997_vm9, %v1629_v50, 0.0  ;;  %v1645_v33 = vrot.slane %v1644_v0, 1 }
 0x641   : > { %v1662_v49 = vrot.slane %v1661_v26, 4 }
 0x642   : > { %v1646_v19 = vadd.f32 %v1645_v33, %v1644_v0 }
 0x643   : > { %v1663_v48 = vadd.f32 %v1662_v49, %v1661_v26 }
 0x645   : > { %v1617_v53 = vpop.permute.xlu2 %1616  ;;  %v1575_v54 = vpop.permute.xlu0 %1574  ;;  %v1664_v63 = vrot.slane %v1663_v48, 2 }
 0x646   : > { %v1625_v4 = vmul.f32 %v1575_v54, %v2551_v10  ;;  %v1631_v62 = vmul.f32 %v1617_v53, %v2549_v9  ;;  %v1652_v9 = vrot.slane %v1651_v57, 1 }
 0x647   : > { %v1665_v22 = vadd.f32 %v1664_v63, %v1663_v48 }
 0x648   : > { %v1633_v27 = vsel %vm2998_vm4, %v1625_v4, 0.0  ;;  %v1675_v7 = vsel %vm2999_vm5, %v1631_v62, 0.0  ;;  %v1653_v58 = vadd.f32 %v1652_v9, %v1651_v57 }
 0x649   : > { %v1634_v35 = vrot.slane %v1633_v27, 4  ;;  %v1676_v61 = vrot.slane %v1675_v7, 4  ;;  %v1666_v23 = vrot.slane %v1665_v22, 1 }
 0x64b   : > { %v1635_v42 = vadd.f32 %v1634_v35, %v1633_v27  ;;  %v1677_v25 = vadd.f32 %v1676_v61, %v1675_v7  ;;  %v1667_v29 = vadd.f32 %v1666_v23, %v1665_v22 }
 0x64d   : > { %v1636_v8 = vrot.slane %v1635_v42, 2  ;;  %v1762_v28 = vpop.permute.xlu2 %1761  ;;  %v1596_v60 = vpop.permute.xlu0 %1595  ;;  %v1678_v21 = vrot.slane %v1677_v25, 2 }
 0x64e   : > { %1764 = vst.msk [vmem:[%s2920_s25] sm:$0xff] %vm536_vm11, %v1762_v28  ;;  %v1628_v10 = vmul.f32 %v1596_v60, %v2553_v11  ;;  %vm3001_vm11 = vmmov %vm2998_vm4 }
 0x64f   : > { %v1637_v17 = vadd.f32 %v1636_v8, %v1635_v42  ;;  %v1679_v24 = vadd.f32 %v1678_v21, %v1677_v25 }
 0x650   : > { %v1654_v6 = vsel %vm3000_vm6, %v1628_v10, 0.0 }
 0x651   : > { %v1638_v37 = vrot.slane %v1637_v17, 1  ;;  %v1655_v47 = vrot.slane %v1654_v6, 4  ;;  %v1680_v15 = vrot.slane %v1679_v24, 1 }
 0x653   : > { %v1639_v18 = vadd.f32 %v1638_v37, %v1637_v17  ;;  %v1656_v2 = vadd.f32 %v1655_v47, %v1654_v6  ;;  %v1681_v38 = vadd.f32 %v1680_v15, %v1679_v24 }
 0x655   : > { %v1773_v59 = vsel %vm1077_vm12, %v1646_v19, %v1639_v18  ;;  %v1657_v39 = vrot.slane %v1656_v2, 2  ;;  %v1610_v56 = vpop.permute.xlu0 %1609  ;;  %vm3002_vm12 = vmmov %vm2998_vm4 }
 0x656   : > { %v1630_v11 = vmul.f32 %v1610_v56, %v2555_v12  ;;  %v1774_v40 = vsel %vm1079_vm13, %v1653_v58, %v1773_v59  ;;  %vm1783_vm13 = vcmask 785664  }
 0x657   : > { %v1658_v30 = vadd.f32 %v1657_v39, %v1656_v2 }
 0x658   : > { %v1668_v16 = vsel %vm3001_vm11, %v1630_v11, 0.0 }
 0x659   : > { %v1659_v34 = vrot.slane %v1658_v30, 1  ;;  %v1669_v31 = vrot.slane %v1668_v16, 4 }
 0x65b   : > { %v1660_v41 = vadd.f32 %v1659_v34, %v1658_v30  ;;  %v1670_v36 = vadd.f32 %v1669_v31, %v1668_v16 }
 0x65d   : > { %v1671_v43 = vrot.slane %v1670_v36, 2  ;;  %v1624_v14 = vpop.permute.xlu0 %1623  ;;  %v1775_v44 = vsel %vm1081_vm14, %v1660_v41, %v1774_v40  ;;  %vm1785_vm14 = vcmask 1048320  }
 0x65e   : > { %v1632_v45 = vmul.f32 %v1624_v14, %v2557_v13  ;;  %v1776_v12 = vsel %vm1083_vm15, %v1667_v29, %v1775_v44 }
 0x65f   : > { %v1672_v3 = vadd.f32 %v1671_v43, %v1670_v36 }
 0x660   : > { %v1682_v52 = vsel %vm3002_vm12, %v1632_v45, 0.0 }
 0x661   : > { %v1673_v46 = vrot.slane %v1672_v3, 1  ;;  %v1683_v5 = vrot.slane %v1682_v52, 4 }
 0x663   : > { %v1674_v20 = vadd.f32 %v1673_v46, %v1672_v3  ;;  %v1684_v50 = vadd.f32 %v1683_v5, %v1682_v52 }
 0x665   : > { %v1685_v51 = vrot.slane %v1684_v50, 2  ;;  %v1777_v26 = vsel %vm1085_vm0, %v1674_v20, %v1776_v12 }
 0x666   : > { %v1778_v53 = vsel %vm1087_vm1, %v1681_v38, %v1777_v26 }
 0x667   : > { %v1686_v13 = vadd.f32 %v1685_v51, %v1684_v50 }
 0x669   : > { %v1687_v54 = vrot.slane %v1686_v13, 1 }
 0x66b   : > { %v1688_v4 = vadd.f32 %v1687_v54, %v1686_v13 }
 0x66d   : > { %v1779_v1 = vsel %vm1089_vm2, %v1688_v4, %v1778_v53 }
 0x66e   : > { %1780 = vrot.lane.b32.xlu0 %v1779_v1, %s2140_s28 }
 0x6e0   : > { %v1781_v55 = vpop.permute.xlu0 %1780 }
 0x6e1   : > { %1784 = vst.msk [vmem:[%s2920_s25] sm:$0xff] %vm1783_vm13, %v1781_v55 }
 0x6e2   : > { %1786 = vst.msk [vmem:[%s2920_s25] sm:$0xff] %vm1785_vm14, %v2139_v32 }
 0x6e3   : > { %2099 = shalt.err (!%p2096_p3)
}
 0x6e4   : > { %1971 = dma.vmem_to_hbm [thread:$0]  (%p2255_p5), %s1801_s23, 128, %s1803_s4, %s1788_s27  }
 0x6e5 PF: > { %p1977_p4 = scmp.ge.s32.totalorder %s2134_s15, 2  ;;  %s1814_s26 = sand.u32 1, %s2122_s29  }
 0x6e6   : > { %s1815_s25 = scalar_lea.sflag [#allocation5], %s1814_s26 }
 0x6e7   : > { %p1974_p7 = pnand %p1977_p4, %p2259_p6 }
 0x6e9   : > { %p1975_p8 = pneg %p1974_p7 }
 0x6eb   : > { %2117 = dma.done.wait (%p1975_p8), %s1815_s25, 128  }
 0x6ec   : > { %2119 = vsyncadd (%p1975_p8), %s1815_s25, 4294967168  ;;  %p27_p9 = scmp.ge.s32.totalorder %s2242_s16, 4   ;;  %s3003_s29 = smov %s2126_s30 }
 0x6ed   : > { %s3004_s30 = smov %s2130_s14  ;;  %s3005_s14 = smov %s2253_s19 }
 0x6ee   : > { %s3006_s15 = smov %s2242_s16  ;;  %29 = sbr.rel (!%p27_p9) target bundleno = 7 (0x7), region = 116 }
 0x6f3   :  { %1821 = vsyncpa [#allocation5], 1 }
 0x6f4   :  { %1823 = vsyncpa [#allocation5 + $0x1], 1 }

</bundles_post_ra>
